<compile_context>
chip_gen: v5e
topology: v5e:2x2
jax: 0.10.0
libtpu: 0.0.40
codegen_flags: <defaults>
</compile_context>

<pallas_src>
import functools
import math

import numpy as np

import jax
import jax.numpy as jnp
from jax import lax
from jax.experimental import pallas as pl
from jax.experimental.pallas import tpu as pltpu

BN_EPS = 1e-5


# ---------------------------------------------------------------------------
# Static bilinear-interpolation helpers (host side, align_corners=True).
# ---------------------------------------------------------------------------
def _interp_taps(out_size, in_size):
    """Per output row: (i0, i1, w0, w1) so that out[o] = w0*in[i0] + w1*in[i1]."""
    taps = []
    for o in range(out_size):
        if in_size == 1 or out_size == 1:
            taps.append((0, 0, 1.0, 0.0))
            continue
        src = o * (in_size - 1) / (out_size - 1)
        i0 = min(int(math.floor(src)), in_size - 2)
        frac = src - i0
        taps.append((i0, i0 + 1, 1.0 - frac, frac))
    return taps


def _interp_dense(out_size, in_size):
    m = np.zeros((out_size, in_size), np.float32)
    for o, (i0, i1, a0, a1) in enumerate(_interp_taps(out_size, in_size)):
        m[o, i0] += a0
        m[o, i1] += a1
    return m


# ---------------------------------------------------------------------------
# Kernel helpers.
# ---------------------------------------------------------------------------
def _bn_relu(y, g_ref, b_ref):
    """Training-mode BatchNorm2d + ReLU on (N, C, H*W) f32; biased variance."""
    mean = jnp.mean(y, axis=(0, 2), keepdims=True)
    var = jnp.mean(jnp.square(y - mean), axis=(0, 2), keepdims=True)
    scale = lax.rsqrt(var + BN_EPS) * g_ref[...][None, :, :]
    yn = (y - mean) * scale + b_ref[...][None, :, :]
    return jnp.maximum(yn, 0.0)


def _conv3x3(a_ref, w_ref, masks, cin, n, margin, s, w_img):
    """3x3 'same' conv as a single K=9*cin batched matmul with f32 accumulation.

    a_ref: (N, >=cin, margin + H*W + margin) bf16 scratch with zero lane-margins.
    The 9 taps are shifted lane windows of it; dx!=1 taps are masked for the
    horizontal zero padding (vertical padding is covered by the margins).
    """
    pieces = []
    for dy in range(3):
        for dx in range(3):
            off = margin + (dy - 1) * w_img + (dx - 1)
            tap = a_ref[:, 0:cin, off:off + s]                 # (N, cin, S) bf16
            if dx != 1:
                tap = tap * masks[dx]
            pieces.append(tap)
    rhs = jnp.concatenate(pieces, axis=1)                      # (N, 9*cin, S)
    w_b = jnp.broadcast_to(w_ref[...], (n,) + w_ref.shape)     # (N, Cout, 9*cin)
    return jnp.einsum('nok,nkj->noj', w_b, rhs,
                      preferred_element_type=jnp.float32)      # (N, Cout, S) f32


def _up_kernel(cfg, x1_ref, x2_ref, tfull_ref, masks_ref,
               w1_ref, g1_ref, b1_ref, w2_ref, g2_ref, b2_ref,
               o_ref, a_ref):
    (n, c1, c2, cmid, w_img, margin) = cfg
    s = a_ref.shape[-1] - 2 * margin
    cin1 = c1 + c2

    # Zero the scratch once: lane margins = conv zero padding; rows that F.pad
    # would create are zero rows of the dense upsample operator.
    a_ref[...] = jnp.zeros(a_ref.shape, a_ref.dtype)

    # torch.cat([x2, x1_up], dim=1): x2 occupies channels [0, C2).
    a_ref[:, 0:c2, margin:margin + s] = x2_ref[...]

    # ---- bilinear upsample (align_corners=True) + F.pad of x1 -------------
    # One matmul against the precomputed (H1*W1, H2*W2) operator, then a single
    # lane-dense store into channels [C2, C2+C1) of the flat scratch.
    x1u = jnp.dot(x1_ref[...], tfull_ref[...],
                  preferred_element_type=jnp.float32)          # (N*C1, S) f32
    a_ref[:, c2:c2 + c1, margin:margin + s] = (
        x1u.reshape(n, c1, s).astype(a_ref.dtype))

    masks = (masks_ref[0:1, :], None, masks_ref[2:3, :])

    # ---- DoubleConv: (3x3 conv -> BN -> ReLU) x 2, one matmul per conv ----
    y = _conv3x3(a_ref, w1_ref, masks, cin1, n, margin, s, w_img)
    y = _bn_relu(y, g1_ref, b1_ref)

    # Reuse the same scratch for the second conv: the interior of channels
    # [0, Cmid) is overwritten, the margins stay zero.
    a_ref[:, 0:cmid, margin:margin + s] = y.astype(a_ref.dtype)
    y = _conv3x3(a_ref, w2_ref, masks, cmid, n, margin, s, w_img)
    y = _bn_relu(y, g2_ref, b2_ref)

    o_ref[...] = y                                             # (N, Cout, H*W) f32


# ---------------------------------------------------------------------------
# Wrapper: NCHW in, NCHW out.
# ---------------------------------------------------------------------------
def up_forward(x1_nchw, x2_nchw, params, scale_factor=2):
    w1, g1, b1, w2, g2, b2 = params
    n, c1, h1, w1s = x1_nchw.shape
    n2, c2, h2, w2s = x2_nchw.shape
    assert n2 == n
    hu, wu = h1 * scale_factor, w1s * scale_factor
    diff_y, diff_x = h2 - hu, w2s - wu
    # TODO(synk): negative F.pad (crop) is not supported.
    assert diff_y >= 0 and diff_x >= 0
    off_y, off_x = diff_y // 2, diff_x // 2
    cmid, cin1 = w1.shape[0], w1.shape[1]
    cout = w2.shape[0]
    assert cin1 == c1 + c2 and w2.shape[1] == cmid
    s = h2 * w2s
    margin = w2s + 1                     # covers the widest 3x3 tap shift, +-(W+1)

    # Dense upsample + F.pad operator (host side, static):
    #   T[hi*W1 + wi, ho*W2 + wo] = Th[ho, hi] * Tw[wo, wi]
    # Rows/cols outside the pad window are zero => F.pad's zeros for free.
    th = np.zeros((h2, h1), np.float32)
    th[off_y:off_y + hu, :] = _interp_dense(hu, h1)
    tw_core = np.asarray(
        jnp.asarray(_interp_dense(wu, w1s), jnp.bfloat16).astype(jnp.float32))
    tw = np.zeros((w2s, w1s), np.float32)
    tw[off_x:off_x + wu, :] = tw_core
    tfull_np = np.einsum('oh,pw->hwop', th, tw).reshape(h1 * w1s, s)
    tfull = jnp.asarray(tfull_np, dtype=jnp.float32)

    # Horizontal-padding masks for the dx=0 / dx=2 taps (vertical padding is
    # handled by the zero lane-margins of the scratch).
    col = np.arange(s) % w2s
    masks_np = np.stack(
        [((col + dx - 1 >= 0) & (col + dx - 1 < w2s)).astype(np.float32)
         for dx in range(3)])
    masks = jnp.asarray(masks_np, dtype=jnp.bfloat16)          # (3, H*W)

    # Lane-dense operand layouts (wrapper-side reshapes are free plumbing).
    x1_flat = x1_nchw.reshape(n * c1, h1 * w1s).astype(jnp.float32)
    x2_flat = x2_nchw.reshape(n, c2, s).astype(jnp.bfloat16)
    w1_slab = jnp.transpose(w1, (0, 2, 3, 1)).reshape(
        cmid, 9 * cin1).astype(jnp.bfloat16)                   # [o, (ky, kx, ci)]
    w2_slab = jnp.transpose(w2, (0, 2, 3, 1)).reshape(
        cout, 9 * cmid).astype(jnp.bfloat16)
    g1c = g1.reshape(cmid, 1).astype(jnp.float32)
    b1c = b1.reshape(cmid, 1).astype(jnp.float32)
    g2c = g2.reshape(cout, 1).astype(jnp.float32)
    b2c = b2.reshape(cout, 1).astype(jnp.float32)

    cfg = (n, c1, c2, cmid, w2s, margin)
    vmem = pl.BlockSpec(memory_space=pltpu.MemorySpace.VMEM)
    kernel = functools.partial(_up_kernel, cfg)
    y = pl.pallas_call(
        kernel,
        out_shape=jax.ShapeDtypeStruct((n, cout, s), jnp.float32),
        in_specs=[vmem] * 10,
        out_specs=vmem,
        scratch_shapes=[pltpu.VMEM((n, cin1, s + 2 * margin), jnp.bfloat16)],
    )(x1_flat, x2_flat, tfull, masks,
      w1_slab, g1c, b1c, w2_slab, g2c, b2c)
    return y.reshape(n, cout, h2, w2s)


# ---------------------------------------------------------------------------
# Pure-JAX (XLA) reference for the correctness check.
# ---------------------------------------------------------------------------
def up_forward_ref(x1, x2, params, scale_factor=2):
    w1, g1, b1, w2, g2, b2 = params
    x1 = x1.astype(jnp.float32)
    x2 = x2.astype(jnp.float32)
    w1 = w1.astype(jnp.float32)
    w2 = w2.astype(jnp.float32)
    _, _, h1, w1s = x1.shape
    hu, wu = h1 * scale_factor, w1s * scale_factor
    ty = jnp.asarray(_interp_dense(hu, h1))
    tx = jnp.asarray(_interp_dense(wu, w1s)).astype(jnp.bfloat16).astype(jnp.float32)
    x1u = jnp.einsum('oh,pw,nchw->ncop', ty, tx, x1,
                     precision=lax.Precision.HIGHEST)
    dy, dx = x2.shape[2] - hu, x2.shape[3] - wu
    x1u = jnp.pad(x1u, ((0, 0), (0, 0),
                        (dy // 2, dy - dy // 2), (dx // 2, dx - dx // 2)))
    x = jnp.concatenate([x2, x1u], axis=1)

    def conv(z, w):
        return lax.conv_general_dilated(
            z, w, (1, 1), ((1, 1), (1, 1)),
            dimension_numbers=('NCHW', 'OIHW', 'NCHW'),
            precision=lax.Precision.HIGHEST)

    def bn_relu(z, g, b):
        mean = jnp.mean(z, axis=(0, 2, 3), keepdims=True)
        var = jnp.mean((z - mean) ** 2, axis=(0, 2, 3), keepdims=True)
        zn = (z - mean) * lax.rsqrt(var + BN_EPS)
        return jnp.maximum(zn * g.reshape(1, -1, 1, 1) + b.reshape(1, -1, 1, 1), 0.0)

    y = bn_relu(conv(x, w1), g1, b1)
    y = bn_relu(conv(y, w2), g2, b2)
    return y


if __name__ == "__main__":
    # Up(in_channels=8, out_channels=4, bilinear=True): concat channels = 8,
    # mid channels = 4.  x1 is the low-res feature map, x2 the skip connection.
    in_channels, out_channels = 8, 4
    c1 = c2 = in_channels // 2
    cmid = in_channels // 2

    key = jax.random.PRNGKey(0)
    k1, k2, k3, k4 = jax.random.split(key, 4)
    x1 = jax.random.normal(k1, (2, c1, 8, 8), jnp.float32)
    x2 = jax.random.normal(k2, (2, c2, 16, 16), jnp.float32)
    w1 = jax.random.normal(k3, (cmid, in_channels, 3, 3), jnp.float32) * (2.0 / (in_channels * 9)) ** 0.5
    w2 = jax.random.normal(k4, (out_channels, cmid, 3, 3), jnp.float32) * (2.0 / (cmid * 9)) ** 0.5

    # Quantize data/weights to bf16 once so the kernel (bf16 operands, f32
    # accumulation) and the f32 reference see identical inputs.
    x1 = x1.astype(jnp.bfloat16)
    x2 = x2.astype(jnp.bfloat16)
    w1 = w1.astype(jnp.bfloat16)
    w2 = w2.astype(jnp.bfloat16)

    g1, b1 = jnp.ones((cmid,), jnp.float32), jnp.zeros((cmid,), jnp.float32)
    g2, b2 = jnp.ones((out_channels,), jnp.float32), jnp.zeros((out_channels,), jnp.float32)
    params = (w1, g1, b1, w2, g2, b2)

    out = jax.block_until_ready(up_forward(x1, x2, params))
    ref = jax.block_until_ready(up_forward_ref(x1, x2, params))

    assert out.shape == (2, out_channels, 16, 16), out.shape
    err = float(jnp.max(jnp.abs(out - ref)))
    # Tolerance covers the bf16 rounding of the up-sampled x1 and of the
    # intermediate activations fed back to the MXU (accumulation is f32).
    assert err < 5e-2, f"max abs err {err}"
    print("KERNEL_OK")
</pallas_src>

<mosaic_0001>
module attributes {stable_mosaic.version = 11 : i64} {
  func.func @_up_kernel(%arg0: memref<8x64xf32, #tpu.memory_space<vmem>>, %arg1: memref<2x4x256xbf16, #tpu.memory_space<vmem>>, %arg2: memref<64x256xf32, #tpu.memory_space<vmem>>, %arg3: memref<3x256xbf16, #tpu.memory_space<vmem>>, %arg4: memref<4x72xbf16, #tpu.memory_space<vmem>>, %arg5: memref<4x1xf32, #tpu.memory_space<vmem>>, %arg6: memref<4x1xf32, #tpu.memory_space<vmem>>, %arg7: memref<4x36xbf16, #tpu.memory_space<vmem>>, %arg8: memref<4x1xf32, #tpu.memory_space<vmem>>, %arg9: memref<4x1xf32, #tpu.memory_space<vmem>>, %arg10: memref<2x4x256xf32, #tpu.memory_space<vmem>>, %arg11: memref<2x8x290xbf16, #tpu.memory_space<vmem>>) attributes {dimension_semantics = [], scalar_prefetch = 0 : i64, scratch_operands = 1 : i64, tpu.core_type = #tpu.core_type<tc>} {
    %cst = arith.constant 0.000000e+00 : bf16
    %0 = vector.broadcast %cst : bf16 to vector<2x8x290xbf16>
    %c0 = arith.constant 0 : index
    %c0_0 = arith.constant 0 : index
    %c0_1 = arith.constant 0 : index
    %1 = vector.load %arg11[%c0, %c0_0, %c0_1] : memref<2x8x290xbf16, #tpu.memory_space<vmem>>, vector<2x8x290xbf16>
    tpu.vector_store %arg11[%c0, %c0_0, %c0_1], %0 {strides = array<i32>} : memref<2x8x290xbf16, #tpu.memory_space<vmem>>, vector<2x8x290xbf16>,
    %c0_2 = arith.constant 0 : index
    %c0_3 = arith.constant 0 : index
    %c0_4 = arith.constant 0 : index
    %2 = vector.load %arg1[%c0_2, %c0_3, %c0_4] : memref<2x4x256xbf16, #tpu.memory_space<vmem>>, vector<2x4x256xbf16>
    %c0_5 = arith.constant 0 : index
    %c0_6 = arith.constant 0 : index
    %c17 = arith.constant 17 : index
    %3 = vector.load %arg11[%c0_5, %c0_6, %c17] : memref<2x8x290xbf16, #tpu.memory_space<vmem>>, vector<2x4x256xbf16>
    tpu.vector_store %arg11[%c0_5, %c0_6, %c17], %2 {strides = array<i32>} : memref<2x8x290xbf16, #tpu.memory_space<vmem>>, vector<2x4x256xbf16>,
    %c0_7 = arith.constant 0 : index
    %c0_8 = arith.constant 0 : index
    %4 = vector.load %arg0[%c0_7, %c0_8] : memref<8x64xf32, #tpu.memory_space<vmem>>, vector<8x64xf32>
    %c0_9 = arith.constant 0 : index
    %c0_10 = arith.constant 0 : index
    %5 = vector.load %arg2[%c0_9, %c0_10] : memref<64x256xf32, #tpu.memory_space<vmem>>, vector<64x256xf32>
    %cst_11 = arith.constant dense<0.000000e+00> : vector<8x256xf32>
    %6 = tpu.matmul %4, %5, %cst_11 {dimension_numbers = #tpu.dot_dimension_numbers<[1], [0], [0], [1], [0, 0, 1, 1], [], []>} : vector<8x64xf32>, vector<64x256xf32>, vector<8x256xf32> -> vector<8x256xf32>
    %7 = vector.shape_cast %6 : vector<8x256xf32> to vector<2x4x256xf32>
    %8 = arith.truncf %7 : vector<2x4x256xf32> to vector<2x4x256xbf16>
    %c0_12 = arith.constant 0 : index
    %c4 = arith.constant 4 : index
    %c17_13 = arith.constant 17 : index
    %9 = vector.load %arg11[%c0_12, %c4, %c17_13] : memref<2x8x290xbf16, #tpu.memory_space<vmem>>, vector<2x4x256xbf16>
    tpu.vector_store %arg11[%c0_12, %c4, %c17_13], %8 {strides = array<i32>} : memref<2x8x290xbf16, #tpu.memory_space<vmem>>, vector<2x4x256xbf16>,
    %c0_14 = arith.constant 0 : index
    %c0_15 = arith.constant 0 : index
    %10 = vector.load %arg3[%c0_14, %c0_15] : memref<3x256xbf16, #tpu.memory_space<vmem>>, vector<1x256xbf16>
    %c2 = arith.constant 2 : index
    %c0_16 = arith.constant 0 : index
    %11 = vector.load %arg3[%c2, %c0_16] : memref<3x256xbf16, #tpu.memory_space<vmem>>, vector<1x256xbf16>
    %c0_17 = arith.constant 0 : index
    %c0_18 = arith.constant 0 : index
    %c0_19 = arith.constant 0 : index
    %12 = vector.load %arg11[%c0_17, %c0_18, %c0_19] : memref<2x8x290xbf16, #tpu.memory_space<vmem>>, vector<2x8x256xbf16>
    %13 = vector.shape_cast %10 : vector<1x256xbf16> to vector<1x1x256xbf16>
    %14 = vector.broadcast %13 : vector<1x1x256xbf16> to vector<2x8x256xbf16>
    %15 = arith.mulf %12, %14 : vector<2x8x256xbf16>
    %c0_20 = arith.constant 0 : index
    %c0_21 = arith.constant 0 : index
    %c1 = arith.constant 1 : index
    %16 = vector.load %arg11[%c0_20, %c0_21, %c1] : memref<2x8x290xbf16, #tpu.memory_space<vmem>>, vector<2x8x256xbf16>
    %c0_22 = arith.constant 0 : index
    %c0_23 = arith.constant 0 : index
    %c2_24 = arith.constant 2 : index
    %17 = vector.load %arg11[%c0_22, %c0_23, %c2_24] : memref<2x8x290xbf16, #tpu.memory_space<vmem>>, vector<2x8x256xbf16>
    %18 = vector.shape_cast %11 : vector<1x256xbf16> to vector<1x1x256xbf16>
    %19 = vector.broadcast %18 : vector<1x1x256xbf16> to vector<2x8x256xbf16>
    %20 = arith.mulf %17, %19 : vector<2x8x256xbf16>
    %c0_25 = arith.constant 0 : index
    %c0_26 = arith.constant 0 : index
    %c16 = arith.constant 16 : index
    %21 = vector.load %arg11[%c0_25, %c0_26, %c16] : memref<2x8x290xbf16, #tpu.memory_space<vmem>>, vector<2x8x256xbf16>
    %22 = vector.shape_cast %10 : vector<1x256xbf16> to vector<1x1x256xbf16>
    %23 = vector.broadcast %22 : vector<1x1x256xbf16> to vector<2x8x256xbf16>
    %24 = arith.mulf %21, %23 : vector<2x8x256xbf16>
    %c0_27 = arith.constant 0 : index
    %c0_28 = arith.constant 0 : index
    %c17_29 = arith.constant 17 : index
    %25 = vector.load %arg11[%c0_27, %c0_28, %c17_29] : memref<2x8x290xbf16, #tpu.memory_space<vmem>>, vector<2x8x256xbf16>
    %c0_30 = arith.constant 0 : index
    %c0_31 = arith.constant 0 : index
    %c18 = arith.constant 18 : index
    %26 = vector.load %arg11[%c0_30, %c0_31, %c18] : memref<2x8x290xbf16, #tpu.memory_space<vmem>>, vector<2x8x256xbf16>
    %27 = vector.shape_cast %11 : vector<1x256xbf16> to vector<1x1x256xbf16>
    %28 = vector.broadcast %27 : vector<1x1x256xbf16> to vector<2x8x256xbf16>
    %29 = arith.mulf %26, %28 : vector<2x8x256xbf16>
    %c0_32 = arith.constant 0 : index
    %c0_33 = arith.constant 0 : index
    %c32 = arith.constant 32 : index
    %30 = vector.load %arg11[%c0_32, %c0_33, %c32] : memref<2x8x290xbf16, #tpu.memory_space<vmem>>, vector<2x8x256xbf16>
    %31 = vector.shape_cast %10 : vector<1x256xbf16> to vector<1x1x256xbf16>
    %32 = vector.broadcast %31 : vector<1x1x256xbf16> to vector<2x8x256xbf16>
    %33 = arith.mulf %30, %32 : vector<2x8x256xbf16>
    %c0_34 = arith.constant 0 : index
    %c0_35 = arith.constant 0 : index
    %c33 = arith.constant 33 : index
    %34 = vector.load %arg11[%c0_34, %c0_35, %c33] : memref<2x8x290xbf16, #tpu.memory_space<vmem>>, vector<2x8x256xbf16>
    %c0_36 = arith.constant 0 : index
    %c0_37 = arith.constant 0 : index
    %c34 = arith.constant 34 : index
    %35 = vector.load %arg11[%c0_36, %c0_37, %c34] : memref<2x8x290xbf16, #tpu.memory_space<vmem>>, vector<2x8x256xbf16>
    %36 = vector.shape_cast %11 : vector<1x256xbf16> to vector<1x1x256xbf16>
    %37 = vector.broadcast %36 : vector<1x1x256xbf16> to vector<2x8x256xbf16>
    %38 = arith.mulf %35, %37 : vector<2x8x256xbf16>
    %39 = tpu.concatenate %15, %16, %20, %24, %25, %29, %33, %34, %38 in 1 : vector<2x8x256xbf16>, vector<2x8x256xbf16>, vector<2x8x256xbf16>, vector<2x8x256xbf16>, vector<2x8x256xbf16>, vector<2x8x256xbf16>, vector<2x8x256xbf16>, vector<2x8x256xbf16>, vector<2x8x256xbf16> -> vector<2x72x256xbf16>
    %c0_38 = arith.constant 0 : index
    %c0_39 = arith.constant 0 : index
    %40 = vector.load %arg4[%c0_38, %c0_39] : memref<4x72xbf16, #tpu.memory_space<vmem>>, vector<4x72xbf16>
    %41 = vector.shape_cast %40 : vector<4x72xbf16> to vector<1x4x72xbf16>
    %42 = vector.broadcast %41 : vector<1x4x72xbf16> to vector<2x4x72xbf16>
    "tpu.trace_start"() <{level = 10 : i32, message = "nok,nkj->noj"}> : () -> ()
    %cst_40 = arith.constant dense<0.000000e+00> : vector<2x4x256xf32>
    %43 = tpu.matmul %42, %39, %cst_40 {dimension_numbers = #tpu.dot_dimension_numbers<[2], [1], [1], [2], [0, 0, 0, 1, 1, 2], [0], [0]>} : vector<2x4x72xbf16>, vector<2x72x256xbf16>, vector<2x4x256xf32> -> vector<2x4x256xf32>
    "tpu.trace_stop"() : () -> ()
    %cst_41 = arith.constant dense<0.000000e+00> : vector<4xf32>
    %44 = vector.multi_reduction <add>, %43, %cst_41 [0, 2] : vector<2x4x256xf32> to vector<4xf32>
    %45 = vector.shape_cast %44 : vector<4xf32> to vector<1x4x1xf32>
    %cst_42 = arith.constant 5.120000e+02 : f32
    %46 = vector.broadcast %cst_42 : f32 to vector<1x4x1xf32>
    %47 = arith.divf %45, %46 : vector<1x4x1xf32>
    %48 = vector.broadcast %47 : vector<1x4x1xf32> to vector<2x4x256xf32>
    %49 = arith.subf %43, %48 : vector<2x4x256xf32>
    %50 = arith.mulf %49, %49 : vector<2x4x256xf32>
    %cst_43 = arith.constant dense<0.000000e+00> : vector<4xf32>
    %51 = vector.multi_reduction <add>, %50, %cst_43 [0, 2] : vector<2x4x256xf32> to vector<4xf32>
    %52 = vector.shape_cast %51 : vector<4xf32> to vector<1x4x1xf32>
    %cst_44 = arith.constant 5.120000e+02 : f32
    %53 = vector.broadcast %cst_44 : f32 to vector<1x4x1xf32>
    %54 = arith.divf %52, %53 : vector<1x4x1xf32>
    %cst_45 = arith.constant 9.99999974E-6 : f32
    %55 = vector.broadcast %cst_45 : f32 to vector<1x4x1xf32>
    %56 = arith.addf %54, %55 : vector<1x4x1xf32>
    %57 = math.rsqrt %56 : vector<1x4x1xf32>
    %c0_46 = arith.constant 0 : index
    %c0_47 = arith.constant 0 : index
    %58 = vector.load %arg5[%c0_46, %c0_47] : memref<4x1xf32, #tpu.memory_space<vmem>>, vector<4x1xf32>
    %59 = vector.shape_cast %58 : vector<4x1xf32> to vector<1x4x1xf32>
    %60 = arith.mulf %57, %59 : vector<1x4x1xf32>
    %61 = vector.broadcast %47 : vector<1x4x1xf32> to vector<2x4x256xf32>
    %62 = arith.subf %43, %61 : vector<2x4x256xf32>
    %63 = vector.broadcast %60 : vector<1x4x1xf32> to vector<2x4x256xf32>
    %64 = arith.mulf %62, %63 : vector<2x4x256xf32>
    %c0_48 = arith.constant 0 : index
    %c0_49 = arith.constant 0 : index
    %65 = vector.load %arg6[%c0_48, %c0_49] : memref<4x1xf32, #tpu.memory_space<vmem>>, vector<4x1xf32>
    %66 = vector.shape_cast %65 : vector<4x1xf32> to vector<1x4x1xf32>
    %67 = vector.broadcast %66 : vector<1x4x1xf32> to vector<2x4x256xf32>
    %68 = arith.addf %64, %67 : vector<2x4x256xf32>
    %cst_50 = arith.constant 0.000000e+00 : f32
    %69 = vector.broadcast %cst_50 : f32 to vector<2x4x256xf32>
    %70 = arith.maximumf %68, %69 : vector<2x4x256xf32>
    %71 = arith.truncf %70 : vector<2x4x256xf32> to vector<2x4x256xbf16>
    %c0_51 = arith.constant 0 : index
    %c0_52 = arith.constant 0 : index
    %c17_53 = arith.constant 17 : index
    %72 = vector.load %arg11[%c0_51, %c0_52, %c17_53] : memref<2x8x290xbf16, #tpu.memory_space<vmem>>, vector<2x4x256xbf16>
    tpu.vector_store %arg11[%c0_51, %c0_52, %c17_53], %71 {strides = array<i32>} : memref<2x8x290xbf16, #tpu.memory_space<vmem>>, vector<2x4x256xbf16>,
    %c0_54 = arith.constant 0 : index
    %c0_55 = arith.constant 0 : index
    %c0_56 = arith.constant 0 : index
    %73 = vector.load %arg11[%c0_54, %c0_55, %c0_56] : memref<2x8x290xbf16, #tpu.memory_space<vmem>>, vector<2x4x256xbf16>
    %74 = vector.shape_cast %10 : vector<1x256xbf16> to vector<1x1x256xbf16>
    %75 = vector.broadcast %74 : vector<1x1x256xbf16> to vector<2x4x256xbf16>
    %76 = arith.mulf %73, %75 : vector<2x4x256xbf16>
    %c0_57 = arith.constant 0 : index
    %c0_58 = arith.constant 0 : index
    %c1_59 = arith.constant 1 : index
    %77 = vector.load %arg11[%c0_57, %c0_58, %c1_59] : memref<2x8x290xbf16, #tpu.memory_space<vmem>>, vector<2x4x256xbf16>
    %c0_60 = arith.constant 0 : index
    %c0_61 = arith.constant 0 : index
    %c2_62 = arith.constant 2 : index
    %78 = vector.load %arg11[%c0_60, %c0_61, %c2_62] : memref<2x8x290xbf16, #tpu.memory_space<vmem>>, vector<2x4x256xbf16>
    %79 = vector.shape_cast %11 : vector<1x256xbf16> to vector<1x1x256xbf16>
    %80 = vector.broadcast %79 : vector<1x1x256xbf16> to vector<2x4x256xbf16>
    %81 = arith.mulf %78, %80 : vector<2x4x256xbf16>
    %c0_63 = arith.constant 0 : index
    %c0_64 = arith.constant 0 : index
    %c16_65 = arith.constant 16 : index
    %82 = vector.load %arg11[%c0_63, %c0_64, %c16_65] : memref<2x8x290xbf16, #tpu.memory_space<vmem>>, vector<2x4x256xbf16>
    %83 = vector.shape_cast %10 : vector<1x256xbf16> to vector<1x1x256xbf16>
    %84 = vector.broadcast %83 : vector<1x1x256xbf16> to vector<2x4x256xbf16>
    %85 = arith.mulf %82, %84 : vector<2x4x256xbf16>
    %c0_66 = arith.constant 0 : index
    %c0_67 = arith.constant 0 : index
    %c17_68 = arith.constant 17 : index
    %86 = vector.load %arg11[%c0_66, %c0_67, %c17_68] : memref<2x8x290xbf16, #tpu.memory_space<vmem>>, vector<2x4x256xbf16>
    %c0_69 = arith.constant 0 : index
    %c0_70 = arith.constant 0 : index
    %c18_71 = arith.constant 18 : index
    %87 = vector.load %arg11[%c0_69, %c0_70, %c18_71] : memref<2x8x290xbf16, #tpu.memory_space<vmem>>, vector<2x4x256xbf16>
    %88 = vector.shape_cast %11 : vector<1x256xbf16> to vector<1x1x256xbf16>
    %89 = vector.broadcast %88 : vector<1x1x256xbf16> to vector<2x4x256xbf16>
    %90 = arith.mulf %87, %89 : vector<2x4x256xbf16>
    %c0_72 = arith.constant 0 : index
    %c0_73 = arith.constant 0 : index
    %c32_74 = arith.constant 32 : index
    %91 = vector.load %arg11[%c0_72, %c0_73, %c32_74] : memref<2x8x290xbf16, #tpu.memory_space<vmem>>, vector<2x4x256xbf16>
    %92 = vector.shape_cast %10 : vector<1x256xbf16> to vector<1x1x256xbf16>
    %93 = vector.broadcast %92 : vector<1x1x256xbf16> to vector<2x4x256xbf16>
    %94 = arith.mulf %91, %93 : vector<2x4x256xbf16>
    %c0_75 = arith.constant 0 : index
    %c0_76 = arith.constant 0 : index
    %c33_77 = arith.constant 33 : index
    %95 = vector.load %arg11[%c0_75, %c0_76, %c33_77] : memref<2x8x290xbf16, #tpu.memory_space<vmem>>, vector<2x4x256xbf16>
    %c0_78 = arith.constant 0 : index
    %c0_79 = arith.constant 0 : index
    %c34_80 = arith.constant 34 : index
    %96 = vector.load %arg11[%c0_78, %c0_79, %c34_80] : memref<2x8x290xbf16, #tpu.memory_space<vmem>>, vector<2x4x256xbf16>
    %97 = vector.shape_cast %11 : vector<1x256xbf16> to vector<1x1x256xbf16>
    %98 = vector.broadcast %97 : vector<1x1x256xbf16> to vector<2x4x256xbf16>
    %99 = arith.mulf %96, %98 : vector<2x4x256xbf16>
    %100 = tpu.concatenate %76, %77, %81, %85, %86, %90, %94, %95, %99 in 1 : vector<2x4x256xbf16>, vector<2x4x256xbf16>, vector<2x4x256xbf16>, vector<2x4x256xbf16>, vector<2x4x256xbf16>, vector<2x4x256xbf16>, vector<2x4x256xbf16>, vector<2x4x256xbf16>, vector<2x4x256xbf16> -> vector<2x36x256xbf16>
    %c0_81 = arith.constant 0 : index
    %c0_82 = arith.constant 0 : index
    %101 = vector.load %arg7[%c0_81, %c0_82] : memref<4x36xbf16, #tpu.memory_space<vmem>>, vector<4x36xbf16>
    %102 = vector.shape_cast %101 : vector<4x36xbf16> to vector<1x4x36xbf16>
    %103 = vector.broadcast %102 : vector<1x4x36xbf16> to vector<2x4x36xbf16>
    "tpu.trace_start"() <{level = 10 : i32, message = "nok,nkj->noj"}> : () -> ()
    %cst_83 = arith.constant dense<0.000000e+00> : vector<2x4x256xf32>
    %104 = tpu.matmul %103, %100, %cst_83 {dimension_numbers = #tpu.dot_dimension_numbers<[2], [1], [1], [2], [0, 0, 0, 1, 1, 2], [0], [0]>} : vector<2x4x36xbf16>, vector<2x36x256xbf16>, vector<2x4x256xf32> -> vector<2x4x256xf32>
    "tpu.trace_stop"() : () -> ()
    %cst_84 = arith.constant dense<0.000000e+00> : vector<4xf32>
    %105 = vector.multi_reduction <add>, %104, %cst_84 [0, 2] : vector<2x4x256xf32> to vector<4xf32>
    %106 = vector.shape_cast %105 : vector<4xf32> to vector<1x4x1xf32>
    %cst_85 = arith.constant 5.120000e+02 : f32
    %107 = vector.broadcast %cst_85 : f32 to vector<1x4x1xf32>
    %108 = arith.divf %106, %107 : vector<1x4x1xf32>
    %109 = vector.broadcast %108 : vector<1x4x1xf32> to vector<2x4x256xf32>
    %110 = arith.subf %104, %109 : vector<2x4x256xf32>
    %111 = arith.mulf %110, %110 : vector<2x4x256xf32>
    %cst_86 = arith.constant dense<0.000000e+00> : vector<4xf32>
    %112 = vector.multi_reduction <add>, %111, %cst_86 [0, 2] : vector<2x4x256xf32> to vector<4xf32>
    %113 = vector.shape_cast %112 : vector<4xf32> to vector<1x4x1xf32>
    %cst_87 = arith.constant 5.120000e+02 : f32
    %114 = vector.broadcast %cst_87 : f32 to vector<1x4x1xf32>
    %115 = arith.divf %113, %114 : vector<1x4x1xf32>
    %cst_88 = arith.constant 9.99999974E-6 : f32
    %116 = vector.broadcast %cst_88 : f32 to vector<1x4x1xf32>
    %117 = arith.addf %115, %116 : vector<1x4x1xf32>
    %118 = math.rsqrt %117 : vector<1x4x1xf32>
    %c0_89 = arith.constant 0 : index
    %c0_90 = arith.constant 0 : index
    %119 = vector.load %arg8[%c0_89, %c0_90] : memref<4x1xf32, #tpu.memory_space<vmem>>, vector<4x1xf32>
    %120 = vector.shape_cast %119 : vector<4x1xf32> to vector<1x4x1xf32>
    %121 = arith.mulf %118, %120 : vector<1x4x1xf32>
    %122 = vector.broadcast %108 : vector<1x4x1xf32> to vector<2x4x256xf32>
    %123 = arith.subf %104, %122 : vector<2x4x256xf32>
    %124 = vector.broadcast %121 : vector<1x4x1xf32> to vector<2x4x256xf32>
    %125 = arith.mulf %123, %124 : vector<2x4x256xf32>
    %c0_91 = arith.constant 0 : index
    %c0_92 = arith.constant 0 : index
    %126 = vector.load %arg9[%c0_91, %c0_92] : memref<4x1xf32, #tpu.memory_space<vmem>>, vector<4x1xf32>
    %127 = vector.shape_cast %126 : vector<4x1xf32> to vector<1x4x1xf32>
    %128 = vector.broadcast %127 : vector<1x4x1xf32> to vector<2x4x256xf32>
    %129 = arith.addf %125, %128 : vector<2x4x256xf32>
    %cst_93 = arith.constant 0.000000e+00 : f32
    %130 = vector.broadcast %cst_93 : f32 to vector<2x4x256xf32>
    %131 = arith.maximumf %129, %130 : vector<2x4x256xf32>
    %c0_94 = arith.constant 0 : index
    %c0_95 = arith.constant 0 : index
    %c0_96 = arith.constant 0 : index
    %132 = vector.load %arg10[%c0_94, %c0_95, %c0_96] : memref<2x4x256xf32, #tpu.memory_space<vmem>>, vector<2x4x256xf32>
    tpu.vector_store %arg10[%c0_94, %c0_95, %c0_96], %131 {strides = array<i32>} : memref<2x4x256xf32, #tpu.memory_space<vmem>>, vector<2x4x256xf32>,
    return
  }
}

</mosaic_0001>

<bundles_post_ra>
// kernel: tpu_custom_call.1
= control target key start
LH: loop header
LB: loop body
LE: loop exit
PB: predicated region body
PF: predicated region fallthrough
CT: control target
= control target key end

     0   :  { %15 = vsyncpa [#allocation4], 0  ;;  %s2372_s0 = inlined_call_operand.vmem [shape: f32[8,64], index: 0, kind: input, shape index: {}]   ;;  %s2373_s1 = inlined_call_operand.hbm [shape: bf16[2,4,256], index: 1, kind: input, shape index: {}]   ;;  %s2374_s2 = inlined_call_operand.hbm [shape: f32[64,256], index: 2, kind: input, shape index: {}]   ;;  %s2375_s3 = inlined_call_operand.vmem [shape: bf16[3,256], index: 3, kind: input, shape index: {}]   ;;  %s2376_s4 = inlined_call_operand.vmem [shape: bf16[4,72], index: 4, kind: input, shape index: {}]   ;;  %s2377_s5 = inlined_call_operand.vmem [shape: f32[4,1], index: 5, kind: input, shape index: {}]   ;;  %s2378_s6 = inlined_call_operand.vmem [shape: f32[4,1], index: 6, kind: input, shape index: {}]   ;;  %s2379_s7 = inlined_call_operand.vmem [shape: bf16[4,36], index: 7, kind: input, shape index: {}]   ;;  %s2380_s8 = inlined_call_operand.vmem [shape: f32[4,1], index: 8, kind: input, shape index: {}]   ;;  %s2381_s9 = inlined_call_operand.vmem [shape: f32[4,1], index: 9, kind: input, shape index: {}]   ;;  %s2382_s10 = inlined_call_operand.hbm [shape: f32[2,4,256], index: 10, kind: output, shape index: {}]  }
   0x1   :  { %16 = vsyncpa [#allocation7], 0 }
   0x2   :  { %17 = vsyncpa [#allocation5], 0  ;;  %s24_s15 = sshll.u32 %s2373_s1, 4  ;;  %s1673_s16 = smov [#allocation3]   ;;  %s25_s15 = int_to_ptr.hbm [resolvable:$true] %s24_s15 }
   0x3   :  { %s26_s17 = sshll.u32 %s1673_s16, 4  ;;  %s37_s20 = sshll.u32 %s2374_s2, 4  ;;  %s27_s17 = int_to_ptr.vmem [resolvable:$true] %s26_s17  ;;  %s38_s20 = int_to_ptr.hbm [resolvable:$true] %s37_s20 }
   0x4   :  { %s1674_s21 = smov 64   ;;  %s1675_s22 = smov 4  }
   0x5   :  { %32 = dma.hbm_to_vmem [thread:$0]  %s25_s15, 128, %s27_s17, [#allocation4], %s1674_s21, %s1674_s21, %s1675_s22  }
   0x6   :  { %s1676_s23 = smov [#allocation6]   ;;  %s1677_s25 = smov 256  }
   0x7   :  { %s39_s24 = sshll.u32 %s1676_s23, 4  ;;  %s1678_s26 = smov 16   ;;  %s40_s24 = int_to_ptr.vmem [resolvable:$true] %s39_s24 }
   0x8   :  { %45 = dma.hbm_to_vmem [thread:$0]  %s38_s20, 2048, %s40_s24, [#allocation7], %s1677_s25, %s1677_s25, %s1678_s26  }
   0x9   :  { %1667 = dma.done.wait [#allocation4], 128  }
   0xa   :  { %1668 = vsyncadd [#allocation4], 4294967168 }
   0xb   :  { %1669 = dma.done.wait [#allocation7], 2048  }
   0xc   :  { %1670 = vsyncadd [#allocation7], 4294965248  ;;  %v122_v0 = vld [vmem:[#allocation6 + $0x78] sm:$0xff]  ;;  %v121_v1 = vld [vmem:[#allocation6 + $0x70] sm:$0xff]  ;;  %vm123_vm0 = vcmask 523264   ;;  %s1679_s27 = smov 17  }
   0xd   :  { %v120_v2 = vld [vmem:[#allocation6 + $0x68] sm:$0xff]  ;;  %155 = vmatpush.msra.mxu1 %v122_v0  ;;  %135 = vmatpush.msra.mxu0 %v121_v1  ;;  %v119_v3 = vld [vmem:[#allocation6 + $0x60] sm:$0xff]  ;;  %v118_v4 = vld [vmem:[#allocation6 + $0x58] sm:$0xff]  ;;  %vm170_vm1 = vcmask 1043456   ;;  %vm70_vm2 = vcmask 273408   ;;  %v1680_v35 = vmov 0  }
   0xe   :  { %v117_v5 = vld [vmem:[#allocation6 + $0x50] sm:$0xff]  ;;  %v116_v6 = vld [vmem:[#allocation6 + $0x48] sm:$0xff]  ;;  %v115_v7 = vld [vmem:[#allocation6 + $0x40] sm:$0xff]  ;;  %69 = vst [vmem:[#allocation2] sm:$0xff] %v1680_v35  ;;  %1562 = vset.pattern.permute.xlu2 %v1680_v35  ;;  %1588 = vset.pattern.permute.xlu0 %v1680_v35  ;;  %s1681_s11 = smov 32   ;;  %s1683_s12 = smov 18  }
   0xf   :  { %156 = vmatpush.msra.mxu1 %v120_v2  ;;  %136 = vmatpush.msra.mxu0 %v119_v3  ;;  %v114_v8 = vld [vmem:[#allocation6 + $0x38] sm:$0xff]  ;;  %v113_v9 = vld [vmem:[#allocation6 + $0x30] sm:$0xff]  ;;  %v112_v10 = vld [vmem:[#allocation6 + $0x28] sm:$0xff]  ;;  %71 = vst.msk [vmem:[#allocation2 + $0x8] sm:$0xf] %vm70_vm2, %v1680_v35  ;;  %s1684_s13 = smov 34  }
  0x10   :  { %v111_v11 = vld [vmem:[#allocation6 + $0x20] sm:$0xff]  ;;  %v110_v12 = vld [vmem:[#allocation6 + $0x18] sm:$0xff]  ;;  %v109_v13 = vld [vmem:[#allocation6 + $0x10] sm:$0xff]  ;;  %72 = vst [vmem:[#allocation2 + $0xc] sm:$0xff] %v1680_v35  ;;  %vm98_vm3 = vcmask 1041544   ;;  %vm99_vm4 = vcmask 1045508  }
  0x11   :  { %157 = vmatpush.msra.mxu1 %v118_v4  ;;  %137 = vmatpush.msra.mxu0 %v117_v5  ;;  %v108_v14 = vld [vmem:[#allocation6 + $0x8] sm:$0xff]  ;;  %v107_v15 = vld [vmem:[#allocation6] sm:$0xff]  ;;  %v106_v16 = vld [vmem:[%s2372_s0] sm:$0xff]  ;;  %73 = vst.msk [vmem:[#allocation2 + $0x14] sm:$0xf] %vm70_vm2, %v1680_v35  ;;  %vm91_vm5 = vcmask 138240  }
  0x12   :  { %v74_v17 = vld [vmem:[#allocation3] sm:$0xf]  ;;  %v75_v18 = vld [vmem:[#allocation3 + $0x4] sm:$0xf]  ;;  %vm102_vm6 = vcmask 132096   ;;  %vm1789_vm7 = vmor %vm99_vm4, %vm98_vm3  ;;  %vm203_vm8 = vcmask 1043594  }
  0x13   :  { %158 = vmatpush.msra.mxu1 %v116_v6  ;;  %138 = vmatpush.msra.mxu0 %v115_v7  ;;  %77 = vst [vmem:[#allocation1] ss:$2 sm:$0xff] %v74_v17  ;;  %v211_v27 = vld [vmem:[%s2375_s3] sm:$0x5]  ;;  %v212_v37 = vld [vmem:[%s2375_s3] sm:$0xa] }
  0x14   :  { %82 = vst [vmem:[#allocation1 + $0x10] ss:$2 sm:$0xff] %v75_v18  ;;  %s1682_s3 = smov 2   ;;  %vm204_vm9 = vcmask 1047558   ;;  %vm207_vm10 = vcmask 134146   ;;  %s1685_s14 = smov 95  }
  0x15   :  { %159 = vmatpush.msra.mxu1 %v114_v8  ;;  %139 = vmatpush.msra.mxu0 %v113_v9  ;;  %vm205_vm11 = vmor %vm204_vm9, %vm203_vm8  ;;  %s1686_s15 = smov 111   ;;  %s1687_s16 = smov 127   ;;  %vm334_vm12 = vcmask 261120   ;;  %vm296_vm13 = vcmask 130048   ;;  %vm353_vm14 = vcmask 277504   ;;  %vm315_vm15 = vcmask 146432  }
  0x16   :  { %s1688_s17 = smov 96   ;;  %s1689_s18 = smov 112   ;;  %vm2383_vm2 = vcmask 777216   ;;  %vm505_vm3 = vcmask 908288   ;;  %vm406_vm4 = vcmask 1039360   ;;  %vm621_vm8 = vcmask 769024  }
  0x17   :  { %160 = vmatpush.msra.mxu1 %v112_v10  ;;  %140 = vmatpush.msra.mxu0 %v111_v11  ;;  %s1690_s19 = smov 94   ;;  %s1691_s20 = smov 110   ;;  %vm2384_vm9 = vcmask 785408  }
  0x18   :  { %s1692_s21 = smov 126   ;;  %s1489_s30 = sshll.u32 %s2382_s10, 4  ;;  %s1490_s30 = int_to_ptr.hbm [resolvable:$true] %s1489_s30 }
  0x19   :  { %161 = vmatpush.msra.mxu1 %v110_v12  ;;  %141 = vmatpush.msra.mxu0 %v109_v13 }
  0x1a   :  { %v78_v19 = vld.sshfl [vmem:[#allocation1] sm:$0xff pattern:$0x75643120] }
  0x1b   :  { %162 = vmatpush.msra.mxu1 %v108_v14  ;;  %142 = vmatpush.msra.mxu0 %v107_v15  ;;  %v83_v20 = vld.sshfl [vmem:[#allocation1 + $0x10] sm:$0xff pattern:$0x75643120] }
  0x1c   :  { %1504 = vmatmul.msk.f32.vlgmr.msra.gmra.mxu1 %vm123_vm0, %v106_v16  ;;  %1503 = vmatmul.msk.f32.vlgmr.msra.gmra.mxu0 %vm123_vm0, %v106_v16  ;;  %vm265_vm0 = vcmask 15360  }
  0x1d   :  { %85 = vrot.lane.b32.xlu0 %v78_v19, %s1679_s27  ;;  %87 = vrot.lane.b32.xlu1 %v83_v20, %s1679_s27 }
  0x8f   :  { %v86_v58 = vpop.permute.xlu0 %85  ;;  %v88_v62 = vpop.permute.xlu1 %87 }
  0x90   :  { %v89_v60 = vrot.slane %v86_v58, 4  ;;  %v90_v63 = vrot.slane %v88_v62, 4 }
  0x92   :  { %v92_v61 = vsel %vm91_vm5, %v89_v60, %v86_v58  ;;  %103 = vst.msk [vmem:[#allocation2 + $0x8] sm:$0x3] %vm102_vm6, %v89_v60  ;;  %v93_v0 = vsel %vm91_vm5, %v90_v63, %v88_v62 }
  0x93   :  { %101 = vst.msk [vmem:[#allocation2] sm:$0x33] %vm1789_vm7, %v92_v61 }
  0x94   :  { %105 = vst.msk [vmem:[#allocation2 + $0x14] sm:$0x3] %vm102_vm6, %v90_v63 }
  0x95   :  { %104 = vst.msk [vmem:[#allocation2 + $0xc] sm:$0x33] %vm1789_vm7, %v93_v0 }
  0x99   :  { %v164_v21 = vpop.f32.mrf.mxu1  ;;  %v144_v22 = vpop.f32.mrf.mxu0 }
  0x9a   :  { %v169_v23 = vrot.slane %v164_v21, 4 }
  0x9c   :  { %v171_v24 = vsel %vm170_vm1, %v144_v22, %v169_v23  ;;  %v172_v25 = vsel %vm170_vm1, %v169_v23, %v144_v22 }
  0x9d   :  { %v173_v26 = vrot.slane %v172_v25, 4  ;;  %174 = vst [vmem:[#allocation1] ss:$2 sm:$0xff] %v171_v24 }
  0x9f   :  { %178 = vst [vmem:[#allocation1 + $0x10] ss:$2 sm:$0xff] %v173_v26 }
  0xa4   :  { %v175_v28 = vld.sshfl [vmem:[#allocation1] sm:$0xff pattern:$0x75316420]  ;;  %v176_v29 = vld.sshfl [vmem:[#allocation1 + $0x8] sm:$0xff pattern:$0x75316420] }
  0xa5   :  { %v185_v30 = vpack.c.bf16 %v176_v29, %v175_v28 }
  0xa6   :  { %v179_v31 = vld.sshfl [vmem:[#allocation1 + $0x10] sm:$0xff pattern:$0x75316420]  ;;  %v180_v32 = vld.sshfl [vmem:[#allocation1 + $0x18] sm:$0xff pattern:$0x75316420] }
  0xa7   :  { %v189_v33 = vrot.slane %v185_v30, 6  ;;  %v186_v34 = vpack.c.bf16 %v180_v32, %v179_v31  ;;  %216 = vst [vmem:[#allocation1] ss:$4 sm:$0xff] %v211_v27 }
  0xa9   :  { %191 = vrot.lane.b32.xlu0 %v189_v33, %s1679_s27  ;;  %v190_v36 = vrot.slane %v186_v34, 6 }
  0xab   :  { %193 = vrot.lane.b32.xlu1 %v190_v36, %s1679_s27 }
  0xae   :  { %v217_v38 = vld.sshfl [vmem:[#allocation1] sm:$0xff pattern:$0x73625140]  ;;  %v218_v39 = vld.sshfl [vmem:[#allocation1 + $0x8] sm:$0xff pattern:$0x73625140] }
  0xaf   :  { %242 = vst [vmem:[#allocation1] ss:$4 sm:$0xff] %v212_v37  ;;  %v219_v40 = vpack.i.b16 %v217_v38, %v217_v38  ;;  %v222_v41 = vpack.i.b16 %v218_v39, %v218_v39 }
  0xb1   :  { %v221_v42 = vperm.slane %v219_v40, 0  ;;  %v224_v43 = vperm.slane %v222_v41, 0 }
  0xb3   :  { %v1774_v44 = vunpack.c.l.bf16 %v221_v42  ;;  %v1776_v45 = vunpack.c.l.bf16 %v224_v43 }
  0xb5   :  { %v1537_v46 = vpack.i.bf16 %v1776_v45, %v1774_v44 }
  0xb6   :  { %v243_v47 = vld.sshfl [vmem:[#allocation1] sm:$0xff pattern:$0x73625140]  ;;  %v244_v48 = vld.sshfl [vmem:[#allocation1 + $0x8] sm:$0xff pattern:$0x73625140] }
  0xb7   :  { %852 = vst [vmem:[#allocation1] ss:$4 sm:$0xff] %v211_v27  ;;  %1538 = vrot.lane.b32.xlu2 %v1537_v46, %s1681_s11  ;;  %v245_v49 = vpack.i.b16 %v243_v47, %v243_v47  ;;  %v248_v50 = vpack.i.b16 %v244_v48, %v244_v48 }
  0xb9   :  { %v247_v51 = vperm.slane %v245_v49, 1  ;;  %v250_v52 = vperm.slane %v248_v50, 1 }
  0xbb   :  { %v257_v53 = vunpack.c.l.bf16 %v247_v51  ;;  %v258_v54 = vunpack.c.l.bf16 %v250_v52 }
  0xbd   :  { %v1557_v55 = vpack.i.bf16 %v258_v54, %v257_v53 }
  0xbe   :  { %v1781_v56 = vld.sshfl [vmem:[#allocation1] sm:$0xff pattern:$0x73625140]  ;;  %v1783_v57 = vld.sshfl [vmem:[#allocation1 + $0x8] sm:$0xff pattern:$0x73625140] }
  0xbf   :  { %877 = vst [vmem:[#allocation1] ss:$4 sm:$0xff] %v212_v37  ;;  %1558 = vrot.lane.b32.xlu1 %v1557_v55, %s1682_s3  ;;  %1543 = vrot.lane.b32.xlu2 %v1537_v46, %s1678_s26 }
  0xc0   :  { %1553 = vrot.lane.b32.xlu0 %v1557_v55, %s1683_s12 }
  0xc7   :  { %1548 = vrot.lane.b32.xlu2 %v1557_v55, %s1684_s13 }
 0x111   :  { %v1539_v20 = vpop.permute.xlu2 %1538 }
 0x112   :  { %v1541_v25 = vunpack.i.h.bf16 %v1539_v20  ;;  %v1540_v26 = vunpack.i.l.bf16 %v1539_v20 }
 0x114   :  { %v335_v34 = vsel %vm334_vm12, %v1540_v26, %v1541_v25 }
 0x119   :  { %v1544_v35 = vpop.permute.xlu2 %1543 }
 0x11a   :  { %v1845_v46 = vunpack.i.h.bf16 %v1544_v35  ;;  %v1545_v47 = vunpack.i.l.bf16 %v1544_v35 }
 0x11b   :  { %v192_v1 = vpop.permute.xlu0 %191 }
 0x11c   :  { %v195_v2 = vrot.slane %v192_v1, 4  ;;  %v297_v51 = vsel %vm296_vm13, %v1545_v47, %v1845_v46 }
 0x11d   :  { %v194_v3 = vpop.permute.xlu1 %193 }
 0x11e   :  { %v197_v4 = vsel %vm91_vm5, %v195_v2, %v192_v1  ;;  %208 = vst.msk [vmem:[#allocation2 + $0x8] sm:$0xc] %vm207_vm10, %v195_v2  ;;  %v196_v5 = vrot.slane %v194_v3, 4 }
 0x11f   :  { %206 = vst.msk [vmem:[#allocation2] sm:$0xcc] %vm205_vm11, %v197_v4 }
 0x120   :  { %v198_v6 = vsel %vm91_vm5, %v196_v5, %v194_v3  ;;  %210 = vst.msk [vmem:[#allocation2 + $0x14] sm:$0xc] %vm207_vm10, %v196_v5  ;;  %vm538_vm10 = vcmask 900096  }
 0x121   :  { %209 = vst.msk [vmem:[#allocation2 + $0xc] sm:$0xcc] %vm205_vm11, %v198_v6  ;;  %v1549_v5 = vpop.permute.xlu2 %1548  ;;  %vm2385_vm11 = vcmask 916480  }
 0x125   :  { %v281_v7 = vld [vmem:[#allocation2 + $0x8] sm:$0xf] }
 0x126   :  { %v280_v8 = vld [vmem:[#allocation2] sm:$0xff]  ;;  %v483_v9 = vunpack.c.l.b16 %v281_v7  ;;  %v1806_v15 = vld [vmem:[#allocation2 + $0x8] sm:$0xf]  ;;  %v1815_v23 = vunpack.c.l.bf16 %v281_v7 }
 0x127   :  { %v482_v10 = vunpack.c.h.b16 %v280_v8  ;;  %v481_v11 = vunpack.c.l.b16 %v280_v8  ;;  %v384_v16 = vunpack.c.l.b16 %v1806_v15  ;;  %v283_v18 = vld [vmem:[#allocation2 + $0x14] sm:$0xf]  ;;  %v1817_v27 = vunpack.c.l.bf16 %v280_v8 }
 0x128   :  { %v489_v12 = vpack.c.b16 %v483_v9, %v483_v9  ;;  %v282_v19 = vld [vmem:[#allocation2 + $0xc] sm:$0xff]  ;;  %v486_v21 = vunpack.c.l.b16 %v283_v18  ;;  %v1819_v28 = vunpack.c.h.bf16 %v280_v8  ;;  %v341_v33 = vmul.f32 %v1541_v25, %v1815_v23 }
 0x129   :  { %v488_v13 = vpack.c.b16 %v482_v10, %v482_v10  ;;  %v487_v14 = vpack.c.b16 %v481_v11, %v481_v11  ;;  %v390_v17 = vpack.c.b16 %v384_v16, %v384_v16  ;;  %v485_v22 = vunpack.c.h.b16 %v282_v19 }
 0x12a   :  { %580 = vrot.lane.b32.xlu2 %v489_v12, %s1685_s14  ;;  %v492_v24 = vpack.c.b16 %v486_v21, %v486_v21  ;;  %v1824_v30 = vunpack.c.l.bf16 %v282_v19  ;;  %v1826_v31 = vunpack.c.h.bf16 %v282_v19  ;;  %v484_v32 = vunpack.c.l.b16 %v282_v19 }
 0x12b   :  { %578 = vrot.lane.b32.xlu1 %v488_v13, %s1685_s14  ;;  %576 = vrot.lane.b32.xlu0 %v487_v14, %s1685_s14  ;;  %v1822_v29 = vpack.c.b16 %v485_v22, %v485_v22  ;;  %v339_v36 = vmul.f32 %v1540_v26, %v1817_v27  ;;  %v340_v37 = vmul.f32 %v335_v34, %v1819_v28  ;;  %v1863_v61 = vunpack.c.l.bf16 %v283_v18 }
 0x12c   :  { %v231_v38 = vmul.f32 %v1817_v27, %v1774_v44  ;;  %v232_v39 = vmul.f32 %v1819_v28, %v1776_v45  ;;  %v233_v40 = vmul.f32 %v1824_v30, %v1774_v44  ;;  %v1841_v41 = vpack.c.b16 %v484_v32, %v484_v32 }
 0x12d   :  { %v346_v42 = vpack.c.bf16 %v341_v33, %v341_v33  ;;  %v234_v43 = vmul.f32 %v1826_v31, %v1776_v45  ;;  %v345_v49 = vpack.c.bf16 %v340_v37, %v339_v36  ;;  %v303_v45 = vmul.f32 %v1845_v46, %v1815_v23 }
 0x12e   :  { %v1847_v48 = vpack.c.bf16 %v232_v39, %v231_v38  ;;  %v301_v54 = vmul.f32 %v1545_v47, %v1817_v27  ;;  %v302_v55 = vmul.f32 %v297_v51, %v1819_v28  ;;  %v304_v2 = vmul.f32 %v1545_v47, %v1824_v30 }
 0x12f   :  { %v1851_v50 = vpack.c.bf16 %v234_v43, %v233_v40  ;;  %v549_v44 = vunpack.c.l.b16 %v346_v42  ;;  %v548_v52 = vunpack.c.h.b16 %v345_v49  ;;  %v547_v53 = vunpack.c.l.b16 %v345_v49 }
 0x130   :  { %v308_v60 = vpack.c.bf16 %v303_v45, %v303_v45  ;;  %v307_v0 = vpack.c.bf16 %v302_v55, %v301_v54  ;;  %v305_v3 = vmul.f32 %v297_v51, %v1826_v31  ;;  %v344_v4 = vmul.f32 %v1541_v25, %v1863_v61 }
 0x131   :  { %v555_v58 = vpack.c.b16 %v549_v44, %v549_v44  ;;  %v554_v62 = vpack.c.b16 %v548_v52, %v548_v52  ;;  %v553_v63 = vpack.c.b16 %v547_v53, %v547_v53  ;;  %v342_v8 = vmul.f32 %v1540_v26, %v1824_v30 }
 0x132   :  { %497 = vrot.lane.b32.xlu2 %v489_v12, %s1686_s15  ;;  %v450_v1 = vunpack.c.l.b16 %v308_v60  ;;  %v449_v6 = vunpack.c.h.b16 %v307_v0  ;;  %v448_v7 = vunpack.c.l.b16 %v307_v0  ;;  %v343_v9 = vmul.f32 %v335_v34, %v1826_v31  ;;  %v1554_v20 = vpop.permute.xlu0 %1553  ;;  %v1879_v34 = vld [vmem:[#allocation2 + $0x14] sm:$0xf] }
 0x133   :  { %495 = vrot.lane.b32.xlu1 %v488_v13, %s1686_s15  ;;  %493 = vrot.lane.b32.xlu0 %v487_v14, %s1686_s15  ;;  %v309_v11 = vpack.c.bf16 %v305_v3, %v304_v2  ;;  %v1551_v12 = vunpack.i.h.bf16 %v1549_v5  ;;  %v348_v16 = vpack.c.bf16 %v344_v4, %v344_v4  ;;  %v1877_v25 = vunpack.i.h.bf16 %v1554_v20 }
 0x134   :  { %v456_v10 = vpack.c.b16 %v450_v1, %v450_v1  ;;  %v1550_v33 = vunpack.i.l.bf16 %v1549_v5  ;;  %v256_v40 = vunpack.c.l.bf16 %v1879_v34  ;;  %v1555_v51 = vunpack.i.l.bf16 %v1554_v20 }
 0x135   :  { %v451_v18 = vunpack.c.l.b16 %v309_v11  ;;  %v360_v19 = vmul.f32 %v1551_v12, %v1815_v23  ;;  %v552_v21 = vunpack.c.l.b16 %v348_v16  ;;  %v322_v39 = vmul.f32 %v1877_v25, %v1815_v23 }
 0x136   :  { %v354_v42 = vsel %vm353_vm14, %v1550_v33, %v1551_v12  ;;  %v358_v43 = vmul.f32 %v1550_v33, %v1817_v27  ;;  %v452_v44 = vunpack.c.h.b16 %v309_v11  ;;  %v316_v60 = vsel %vm315_vm15, %v1555_v51, %v1877_v25 }
 0x137   :  { %v457_v26 = vpack.c.b16 %v451_v18, %v451_v18  ;;  %v365_v32 = vpack.c.bf16 %v360_v19, %v360_v19  ;;  %v558_v36 = vpack.c.b16 %v552_v21, %v552_v21  ;;  %v359_v47 = vmul.f32 %v354_v42, %v1819_v28 }
 0x138   :  { %v327_v53 = vpack.c.bf16 %v322_v39, %v322_v39  ;;  %v458_v23 = vpack.c.b16 %v452_v44, %v452_v44  ;;  %v320_v0 = vmul.f32 %v1555_v51, %v1817_v27  ;;  %v321_v1 = vmul.f32 %v316_v60, %v1819_v28 }
 0x139   :  { %v599_v38 = vunpack.c.l.b16 %v365_v32  ;;  %v325_v32 = vmul.f32 %v1877_v25, %v1863_v61 }
 0x13a   :  { %398 = vrot.lane.b32.xlu2 %v390_v17, %s1687_s16  ;;  %v347_v17 = vpack.c.bf16 %v343_v9, %v342_v8  ;;  %v326_v8 = vpack.c.bf16 %v321_v1, %v320_v0  ;;  %v253_v9 = vunpack.c.l.bf16 %v1806_v15 }
 0x13b   :  { %396 = vrot.lane.b32.xlu1 %v488_v13, %s1687_s16  ;;  %394 = vrot.lane.b32.xlu0 %v487_v14, %s1687_s16  ;;  %v455_v13 = vpack.c.b16 %v449_v6, %v449_v6  ;;  %v454_v14 = vpack.c.b16 %v448_v7, %v448_v7  ;;  %v605_v52 = vpack.c.b16 %v599_v38, %v599_v38 }
 0x13c   :  { %v550_v22 = vunpack.c.l.b16 %v347_v17  ;;  %v551_v49 = vunpack.c.h.b16 %v347_v17  ;;  %v514_v16 = vunpack.c.l.b16 %v326_v8  ;;  %v329_v39 = vpack.c.bf16 %v325_v32, %v325_v32 }
 0x13d   :  { %v371_v32 = vunpack.c.h.b16 %v1847_v48 }
 0x13e   :  { %v556_v37 = vpack.c.b16 %v550_v22, %v550_v22  ;;  %v557_v54 = vpack.c.b16 %v551_v49, %v551_v49  ;;  %v520_v20 = vpack.c.b16 %v514_v16, %v514_v16  ;;  %v519_v25 = vunpack.c.l.b16 %v329_v39  ;;  %v879_v16 = vld.sshfl [vmem:[#allocation1 + $0x8] sm:$0xff pattern:$0x73625140] }
 0x13f   :  { %v375_v39 = vpack.c.b16 %v371_v32, %v371_v32 }
 0x140   :  { %v525_v44 = vpack.c.b16 %v519_v25, %v519_v25 }
 0x142   :  { %586 = vrot.lane.b32.xlu2 %v492_v24, %s1685_s14 }
 0x143   :  { %503 = vrot.lane.b32.xlu1 %v492_v24, %s1686_s15  ;;  %584 = vrot.lane.b32.xlu0 %v1822_v29, %s1685_s14  ;;  %v1559_v24 = vpop.permute.xlu1 %1558 }
 0x144   :  { %v1561_v35 = vunpack.i.h.bf16 %v1559_v24  ;;  %v1560_v17 = vunpack.i.l.bf16 %v1559_v24 }
 0x146   :  { %v275_v45 = vmul.f32 %v1561_v35, %v256_v40  ;;  %v272_v11 = vmul.f32 %v1561_v35, %v253_v9  ;;  %v266_v22 = vsel %vm265_vm0, %v1560_v17, %v1561_v35  ;;  %v270_v24 = vmul.f32 %v1560_v17, %v1817_v27 }
 0x148   :  { %v279_v55 = vpack.c.bf16 %v275_v45, %v275_v45  ;;  %v277_v19 = vpack.c.bf16 %v272_v11, %v272_v11 }
 0x14a   :  { %582 = vrot.lane.b32.xlu2 %v1841_v41, %s1685_s14  ;;  %v420_v2 = vunpack.c.l.b16 %v279_v55  ;;  %v273_v55 = vmul.f32 %v1560_v17, %v1824_v30  ;;  %v883_v17 = vpack.i.b16 %v879_v16, %v879_v16 }
 0x14b   :  { %501 = vrot.lane.b32.xlu1 %v1822_v29, %s1686_s15  ;;  %499 = vrot.lane.b32.xlu0 %v1841_v41, %s1686_s15 }
 0x14c   :  { %v426_v6 = vpack.c.b16 %v420_v2, %v420_v2 }
 0x152   :  { %563 = vrot.lane.b32.xlu2 %v555_v58, %s1688_s17  ;;  %v364_v58 = vpack.c.bf16 %v359_v47, %v358_v43  ;;  %v323_v43 = vmul.f32 %v1555_v51, %v1824_v30  ;;  %v324_v47 = vmul.f32 %v316_v60, %v1826_v31 }
 0x153   :  { %561 = vrot.lane.b32.xlu1 %v554_v62, %s1688_s17  ;;  %559 = vrot.lane.b32.xlu0 %v553_v63, %s1688_s17  ;;  %v516_v62 = vunpack.c.l.b16 %v327_v53  ;;  %v363_v63 = vmul.f32 %v1551_v12, %v1863_v61  ;;  %v361_v12 = vmul.f32 %v1550_v33, %v1824_v30  ;;  %v271_v33 = vmul.f32 %v1819_v28, %v266_v22 }
 0x154   :  { %v597_v3 = vunpack.c.l.b16 %v364_v58  ;;  %v328_v45 = vpack.c.bf16 %v324_v47, %v323_v43 }
 0x155   :  { %v522_v4 = vpack.c.b16 %v516_v62, %v516_v62  ;;  %v367_v5 = vpack.c.bf16 %v363_v63, %v363_v63 }
 0x156   :  { %v603_v7 = vpack.c.b16 %v597_v3, %v597_v3  ;;  %v518_v62 = vunpack.c.h.b16 %v328_v45 }
 0x158   :  { %v524_v2 = vpack.c.b16 %v518_v62, %v518_v62 }
 0x15a   :  { %464 = vrot.lane.b32.xlu2 %v456_v10, %s1689_s18  ;;  %v602_v10 = vunpack.c.l.b16 %v367_v5 }
 0x15b   :  { %462 = vrot.lane.b32.xlu1 %v455_v13, %s1689_s18  ;;  %460 = vrot.lane.b32.xlu0 %v454_v14, %s1689_s18  ;;  %v362_v13 = vmul.f32 %v354_v42, %v1826_v31  ;;  %v598_v14 = vunpack.c.h.b16 %v364_v58  ;;  %v276_v42 = vpack.c.bf16 %v271_v33, %v270_v24  ;;  %v274_v58 = vmul.f32 %v1826_v31, %v266_v22  ;;  %v816_v22 = vld [vmem:[%s2378_s6] sm:$0xf] }
 0x15c   :  { %v608_v18 = vpack.c.b16 %v602_v10, %v602_v10 }
 0x15d   :  { %v604_v15 = vpack.c.b16 %v598_v14, %v598_v14  ;;  %v366_v21 = vpack.c.bf16 %v362_v13, %v361_v12  ;;  %v415_v49 = vunpack.c.l.b16 %v276_v42  ;;  %v416_v60 = vunpack.c.h.b16 %v276_v42  ;;  %v878_v14 = vld.sshfl [vmem:[#allocation1] sm:$0xff pattern:$0x73625140] }
 0x15e   :  { %v278_v3 = vpack.c.bf16 %v274_v58, %v273_v55 }
 0x15f   :  { %v601_v28 = vunpack.c.h.b16 %v366_v21  ;;  %v421_v53 = vpack.c.b16 %v415_v49, %v415_v49  ;;  %v422_v1 = vpack.c.b16 %v416_v60, %v416_v60 }
 0x162   :  { %466 = vrot.lane.b32.xlu2 %v457_v26, %s1689_s18  ;;  %v417_v26 = vunpack.c.l.b16 %v277_v19 }
 0x163   :  { %569 = vrot.lane.b32.xlu1 %v558_v36, %s1688_s17  ;;  %565 = vrot.lane.b32.xlu0 %v556_v37, %s1688_s17  ;;  %v515_v36 = vunpack.c.h.b16 %v326_v8  ;;  %v600_v37 = vunpack.c.l.b16 %v366_v21 }
 0x164   :  { %v423_v38 = vpack.c.b16 %v417_v26, %v417_v26  ;;  %v885_v26 = vperm.slane %v883_v17, 1 }
 0x165   :  { %v521_v40 = vpack.c.b16 %v515_v36, %v515_v36  ;;  %v606_v35 = vpack.c.b16 %v600_v37, %v600_v37 }
 0x166   :  { %v893_v33 = vunpack.c.l.bf16 %v885_v26 }
 0x16a   :  { %613 = vrot.lane.b32.xlu2 %v605_v52, %s1690_s19  ;;  %v607_v52 = vpack.c.b16 %v601_v28, %v601_v28 }
 0x16b   :  { %567 = vrot.lane.b32.xlu1 %v557_v54, %s1688_s17  ;;  %468 = vrot.lane.b32.xlu0 %v458_v23, %s1689_s18  ;;  %v517_v54 = vunpack.c.l.b16 %v328_v45  ;;  %v306_v23 = vmul.f32 %v1845_v46, %v1863_v61  ;;  %v419_v46 = vunpack.c.h.b16 %v278_v3  ;;  %v418_v61 = vunpack.c.l.b16 %v278_v3 }
 0x16d   :  { %v523_v63 = vpack.c.b16 %v517_v54, %v517_v54  ;;  %v310_v0 = vpack.c.bf16 %v306_v23, %v306_v23  ;;  %v425_v31 = vpack.c.b16 %v419_v46, %v419_v46 }
 0x16f   :  { %v453_v5 = vunpack.c.l.b16 %v310_v0 }
 0x171   :  { %v459_v30 = vpack.c.b16 %v453_v5, %v453_v5 }
 0x172   :  { %530 = vrot.lane.b32.xlu2 %v522_v4, %s1691_s20 }
 0x173   :  { %437 = vrot.lane.b32.xlu1 %v426_v6, %s1692_s21  ;;  %609 = vrot.lane.b32.xlu0 %v603_v7, %s1690_s19  ;;  %v424_v6 = vpack.c.b16 %v418_v61, %v418_v61  ;;  %v387_v7 = vunpack.c.l.b16 %v1879_v34  ;;  %v880_v34 = vpack.i.b16 %v878_v14, %v878_v14 }
 0x175   :  { %v393_v13 = vpack.c.b16 %v387_v7, %v387_v7 }
 0x17a   :  { %619 = vrot.lane.b32.xlu2 %v608_v18, %s1690_s19 }
 0x17b   :  { %611 = vrot.lane.b32.xlu1 %v604_v15, %s1690_s19  ;;  %526 = vrot.lane.b32.xlu0 %v520_v20, %s1691_s20 }
 0x182   :  { %431 = vrot.lane.b32.xlu2 %v423_v38, %s1692_s21 }
 0x183   :  { %528 = vrot.lane.b32.xlu1 %v521_v40, %s1691_s20  ;;  %615 = vrot.lane.b32.xlu0 %v606_v35, %s1690_s19 }
 0x184   :  { %v581_v27 = vpop.permute.xlu2 %580 }
 0x18a   :  { %536 = vrot.lane.b32.xlu2 %v525_v44, %s1691_s20 }
 0x18b   :  { %617 = vrot.lane.b32.xlu1 %v607_v52, %s1690_s19  ;;  %427 = vrot.lane.b32.xlu0 %v421_v53, %s1692_s21 }
 0x18c   :  { %v498_v51 = vpop.permute.xlu2 %497 }
 0x192   :  { %532 = vrot.lane.b32.xlu2 %v523_v63, %s1691_s20 }
 0x193   :  { %429 = vrot.lane.b32.xlu1 %v422_v1, %s1692_s21  ;;  %534 = vrot.lane.b32.xlu0 %v524_v2, %s1691_s20 }
 0x194   :  { %v399_v4 = vpop.permute.xlu2 %398 }
 0x19a   :  { %470 = vrot.lane.b32.xlu2 %v459_v30, %s1689_s18 }
 0x19b   :  { %435 = vrot.lane.b32.xlu1 %v425_v31, %s1692_s21  ;;  %433 = vrot.lane.b32.xlu0 %v424_v6, %s1692_s21 }
 0x19c   :  { %v587_v8 = vpop.permute.xlu2 %586 }
 0x19d   :  { %v579_v9 = vpop.permute.xlu1 %578  ;;  %v577_v10 = vpop.permute.xlu0 %576 }
 0x19e   :  { %v1932_v11 = vsel %vm2383_vm2, %v579_v9, %v581_v27  ;;  %v1935_v12 = vsel %vm2383_vm2, %v577_v10, %v579_v9 }
 0x1a2   :  { %404 = vrot.lane.b32.xlu2 %v393_v13, %s1687_s16 }
 0x1a3   :  { %402 = vrot.lane.b32.xlu1 %v1822_v29, %s1687_s16  ;;  %400 = vrot.lane.b32.xlu0 %v1841_v41, %s1687_s16  ;;  %v882_v29 = vperm.slane %v880_v34, 1  ;;  %v370_v41 = vunpack.c.l.b16 %v1847_v48 }
 0x1a4   :  { %v583_v15 = vpop.permute.xlu2 %582 }
 0x1a5   :  { %v496_v18 = vpop.permute.xlu1 %495  ;;  %v494_v19 = vpop.permute.xlu0 %493  ;;  %v892_v24 = vunpack.c.l.bf16 %v882_v29  ;;  %v374_v38 = vpack.c.b16 %v370_v41, %v370_v41 }
 0x1a6   :  { %v1943_v20 = vsel %vm505_vm3, %v496_v18, %v498_v51  ;;  %v1946_v21 = vsel %vm505_vm3, %v494_v19, %v496_v18 }
 0x1a7   :  { %v1563_v42 = vpack.i.bf16 %v893_v33, %v892_v24 }
 0x1aa   :  { %819 = vperm.xlu2 %1562, %v816_v22  }
 0x1ac   :  { %v564_v27 = vpop.permute.xlu2 %563 }
 0x1ad   :  { %v397_v36 = vpop.permute.xlu1 %396  ;;  %v395_v37 = vpop.permute.xlu0 %394 }
 0x1ae   :  { %v408_v40 = vsel %vm406_vm4, %v397_v36, %v399_v4  ;;  %v407_v35 = vsel %vm406_vm4, %v395_v37, %v397_v36 }
 0x1af   :  { %v1956_v43 = vsel %vm170_vm1, %v374_v38, %v407_v35  ;;  %v1959_v47 = vsel %vm170_vm1, %v375_v39, %v408_v40 }
 0x1b2   :  { %1564 = vrot.lane.b32.xlu2 %v1563_v42, %s1683_s12 }
 0x1b4   :  { %v1969_v44 = vpop.permute.xlu2 %464 }
 0x1b5   :  { %v504_v48 = vpop.permute.xlu1 %503  ;;  %v585_v25 = vpop.permute.xlu0 %584 }
 0x1b6   :  { %v1963_v28 = vsel %vm2383_vm2, %v583_v15, %v585_v25  ;;  %v1966_v49 = vsel %vm2383_vm2, %v585_v25, %v587_v8  ;;  %vm2386_vm2 = vcmask 1031168  }
 0x1ba   :  { %1569 = vrot.lane.b32.xlu2 %v1563_v42, %s1684_s13 }
 0x1bc   :  { %v1978_v54 = vpop.permute.xlu2 %466 }
 0x1bd   :  { %v502_v45 = vpop.permute.xlu1 %501  ;;  %v500_v52 = vpop.permute.xlu0 %499 }
 0x1be   :  { %v1972_v53 = vsel %vm505_vm3, %v502_v45, %v504_v48  ;;  %v1975_v51 = vsel %vm505_vm3, %v500_v52, %v502_v45 }
 0x1c2   :  { %1584 = vrot.lane.b32.xlu2 %v1563_v42, %s1682_s3 }
 0x1c4   :  { %v614_v62 = vpop.permute.xlu2 %613 }
 0x1c5   :  { %v562_v23 = vpop.permute.xlu1 %561  ;;  %v560_v55 = vpop.permute.xlu0 %559 }
 0x1c6   :  { %v573_v10 = vsel %vm2384_vm9, %v562_v23, %v564_v27  ;;  %v572_v13 = vsel %vm2384_vm9, %v560_v55, %v562_v23  ;;  %v690_v23 = vld [vmem:[%s2376_s4] sm:$0x3] }
 0x1c7   :  { %v676_v14 = vsel %vm170_vm1, %v572_v13, %v1935_v12  ;;  %v680_v16 = vsel %vm170_vm1, %v573_v10, %v1932_v11 }
 0x1cc   :  { %v531_v1 = vpop.permute.xlu2 %530 }
 0x1cd   :  { %v463_v58 = vpop.permute.xlu1 %462  ;;  %v461_v60 = vpop.permute.xlu0 %460 }
 0x1ce   :  { %v474_v38 = vsel %vm2385_vm11, %v463_v58, %v1969_v44  ;;  %v473_v39 = vsel %vm2385_vm11, %v461_v60, %v463_v58 }
 0x1d4   :  { %v620_v4 = vpop.permute.xlu2 %619 }
 0x1d5   :  { %v570_v63 = vpop.permute.xlu1 %569  ;;  %v566_v0 = vpop.permute.xlu0 %565 }
 0x1dc   :  { %v432_v61 = vpop.permute.xlu2 %431 }
 0x1dd   :  { %v568_v2 = vpop.permute.xlu1 %567  ;;  %v1980_v3 = vpop.permute.xlu0 %468 }
 0x1de   :  { %v574_v33 = vsel %vm2384_vm9, %v566_v0, %v568_v2  ;;  %v575_v36 = vsel %vm2384_vm9, %v568_v2, %v570_v63  ;;  %vm691_vm9 = vcmask 588800   ;;  %v373_v63 = vunpack.c.h.b16 %v1851_v50 }
 0x1df   :  { %v688_v37 = vsel %vm170_vm1, %v575_v36, %v1966_v49 }
 0x1e4   :  { %v537_v18 = vpop.permute.xlu2 %536 }
 0x1e5   :  { %v1982_v5 = vpop.permute.xlu1 %437  ;;  %v610_v46 = vpop.permute.xlu0 %609 }
 0x1ed   :  { %v612_v30 = vpop.permute.xlu1 %611  ;;  %v527_v31 = vpop.permute.xlu0 %526 }
 0x1ee   :  { %v622_v6 = vsel %vm621_vm8, %v610_v46, %v612_v30  ;;  %v623_v7 = vsel %vm621_vm8, %v612_v30, %v614_v62 }
 0x1ef   :  { %v696_v8 = vsel %vm170_vm1, %v622_v6, 0  ;;  %v699_v9 = vsel %vm170_vm1, %v623_v7, 0 }
 0x1f0   :  { %704 = vmatpush.bf16.msra.mxu2 %v696_v8  ;;  %717 = vmatpush.bf16.msra.mxu3 %v699_v9 }
 0x1f4   :  { %705 = vmatpush.bf16.msra.mxu2 %v676_v14  ;;  %718 = vmatpush.bf16.msra.mxu3 %v680_v16 }
 0x1f5   :  { %v529_v34 = vpop.permute.xlu1 %528  ;;  %v616_v17 = vpop.permute.xlu0 %615 }
 0x1f6   :  { %v539_v19 = vsel %vm538_vm10, %v527_v31, %v529_v34  ;;  %v540_v15 = vsel %vm538_vm10, %v529_v34, %v531_v1 }
 0x1f7   :  { %v660_v22 = vsel %vm170_vm1, %v1946_v21, %v539_v19  ;;  %v664_v29 = vsel %vm170_vm1, %v1943_v20, %v540_v15  ;;  %v533_v21 = vpop.permute.xlu2 %532  ;;  %v684_v20 = vsel %vm170_vm1, %v574_v33, %v1963_v28 }
 0x1f8   :  { %706 = vmatpush.bf16.msra.mxu2 %v660_v22  ;;  %719 = vmatpush.bf16.msra.mxu3 %v664_v29  ;;  %v855_v22 = vpack.i.b16 %v1781_v56, %v1781_v56  ;;  %v858_v29 = vpack.i.b16 %v1783_v57, %v1783_v57 }
 0x1fd   :  { %v618_v12 = vpop.permute.xlu1 %617  ;;  %v428_v11 = vpop.permute.xlu0 %427 }
 0x1fe   :  { %v624_v26 = vsel %vm621_vm8, %v616_v17, %v618_v12  ;;  %v625_v41 = vsel %vm621_vm8, %v618_v12, %v620_v4  ;;  %v377_v4 = vpack.c.b16 %v373_v63, %v373_v63  ;;  %v857_v12 = vperm.slane %v855_v22, 0 }
 0x1ff   :  { %v728_v32 = vsel %vm170_vm1, %v624_v26, 0  ;;  %v731_v24 = vsel %vm170_vm1, %v625_v41, 0  ;;  %v471_v52 = vpop.permute.xlu2 %470 }
 0x200   :  { %736 = vmatpush.bf16.msrb.mxu0 %v728_v32  ;;  %749 = vmatpush.bf16.msrb.mxu1 %v731_v24  ;;  %v2056_v26 = vunpack.c.l.bf16 %v857_v12  ;;  %v1693_v24 = vmov 512.0  }
 0x201   :  { %1589 = vrcp.f32 %v1693_v24 }
 0x204   :  { %737 = vmatpush.bf16.msrb.mxu0 %v684_v20  ;;  %750 = vmatpush.bf16.msrb.mxu1 %v688_v37 }
 0x205   :  { %v430_v40 = vpop.permute.xlu1 %429  ;;  %v535_v35 = vpop.permute.xlu0 %534 }
 0x206   :  { %v440_v42 = vsel %vm2386_vm2, %v428_v11, %v430_v40  ;;  %v441_v27 = vsel %vm2386_vm2, %v430_v40, %v432_v61  ;;  %v541_v48 = vsel %vm538_vm10, %v533_v21, %v535_v35  ;;  %v542_v25 = vsel %vm538_vm10, %v535_v35, %v537_v18 }
 0x207   :  { %v644_v28 = vsel %vm170_vm1, %v440_v42, %v473_v39  ;;  %v648_v49 = vsel %vm170_vm1, %v441_v27, %v474_v38  ;;  %v668_v45 = vsel %vm170_vm1, %v1975_v51, %v541_v48  ;;  %v672_v44 = vsel %vm170_vm1, %v1972_v53, %v542_v25  ;;  %v405_v0 = vpop.permute.xlu2 %404  ;;  %v1590_v33 = vpop.eup %1589 }
 0x208   :  { %707 = vmatpush.bf16.msra.mxu2 %v644_v28  ;;  %720 = vmatpush.bf16.msra.mxu3 %v648_v49  ;;  %v475_v53 = vsel %vm2385_vm11, %v1978_v54, %v1980_v3  ;;  %v476_v51 = vsel %vm2385_vm11, %v1980_v3, %v471_v52  ;;  %v372_v54 = vunpack.c.l.b16 %v1851_v50  ;;  %v860_v11 = vperm.slane %v858_v29, 0 }
 0x209   :  { %738 = vmatpush.bf16.msrb.mxu0 %v668_v45  ;;  %751 = vmatpush.bf16.msrb.mxu1 %v672_v44  ;;  %v769_v36 = vmul.f32 512.0, %v1590_v33 }
 0x20a   :  { %v376_v3 = vpack.c.b16 %v372_v54, %v372_v54  ;;  %v2058_v41 = vunpack.c.l.bf16 %v860_v11 }
 0x20b   :  { %v770_v21 = vsub.f32 1.0, %v769_v36 }
 0x20c   :  { %708 = vmatpush.bf16.msra.mxu2 %v1956_v43  ;;  %721 = vmatpush.bf16.msra.mxu3 %v1959_v47  ;;  %v1573_v32 = vpack.i.bf16 %v2058_v41, %v2056_v26 }
 0x20d   :  { %v436_v55 = vpop.permute.xlu1 %435  ;;  %v434_v58 = vpop.permute.xlu0 %433  ;;  %v771_v56 = vmul.f32 %v1590_v33, %v770_v21 }
 0x20e   :  { %v443_v60 = vsel %vm2386_vm2, %v436_v55, %v1982_v5  ;;  %v442_v43 = vsel %vm2386_vm2, %v434_v58, %v436_v55 }
 0x20f   :  { %1505 = vmatmul.msk.bf16.vlgmr.msra.gmra.mxu2 %vm691_vm9, %v690_v23  ;;  %1506 = vmatmul.msk.bf16.vlgmr.msra.gmra.mxu3 %vm691_vm9, %v690_v23  ;;  %v652_v47 = vsel %vm170_vm1, %v442_v43, %v475_v53  ;;  %v656_v62 = vsel %vm170_vm1, %v443_v60, %v476_v51  ;;  %v772_v20 = vadd.f32 %v1590_v33, %v771_v56 }
 0x210   :  { %739 = vmatpush.bf16.msrb.mxu0 %v652_v47  ;;  %752 = vmatpush.bf16.msrb.mxu1 %v656_v62 }
 0x215   :  { %v403_v1 = vpop.permute.xlu1 %402  ;;  %v401_v2 = vpop.permute.xlu0 %400 }
 0x216   :  { %v410_v5 = vsel %vm406_vm4, %v403_v1, %v405_v0  ;;  %v409_v46 = vsel %vm406_vm4, %v401_v2, %v403_v1  ;;  %v805_v1 = vld [vmem:[%s2377_s5] sm:$0xf] }
 0x217   :  { %v636_v61 = vsel %vm170_vm1, %v376_v3, %v409_v46  ;;  %v640_v30 = vsel %vm170_vm1, %v377_v4, %v410_v5  ;;  %v820_v4 = vpop.permute.xlu2 %819 }
 0x218   :  { %740 = vmatpush.bf16.msrb.mxu0 %v636_v61  ;;  %753 = vmatpush.bf16.msrb.mxu1 %v640_v30 }
 0x21b   :  { %1507 = vmatmul.msk.bf16.vlgmr.msrb.gmra.mxu0 %vm691_vm9, %v690_v23  ;;  %1508 = vmatmul.msk.bf16.vlgmr.msrb.gmra.mxu1 %vm691_vm9, %v690_v23  ;;  %vm773_vm9 = vweird.f32 %v1590_v33 }
 0x21c   :  { %v2063_v57 = vsel %vm773_vm9, %v1590_v33, %v772_v20 }
 0x21f   :  { %v2075_v5 = vpop.permute.xlu2 %1564 }
 0x227   :  { %v2077_v46 = vpop.permute.xlu2 %1569 }
 0x22f   :  { %v2079_v61 = vpop.permute.xlu2 %1584 }
 0x292   :  { %v710_v50 = vpop.f32.mrf.mxu2  ;;  %v723_v31 = vpop.f32.mrf.mxu3 }
 0x293   :  { %v759_v6 = vsel %vm170_vm1, %v710_v50, 0.0  ;;  %v760_v7 = vsel %vm170_vm1, %v723_v31, 0.0 }
 0x294   :  { %v761_v8 = vadd.f32 %v760_v7, %v759_v6 }
 0x298   :  { %v742_v9 = vpop.f32.mrf.mxu0  ;;  %v755_v10 = vpop.f32.mrf.mxu1 }
 0x299   :  { %v762_v13 = vsel %vm170_vm1, %v742_v9, 0.0  ;;  %v764_v14 = vsel %vm170_vm1, %v755_v10, 0.0 }
 0x29a   :  { %v763_v16 = vadd.f32 %v762_v13, %v761_v8  ;;  %v712_v34 = vpop.f32.mrf.mxu2  ;;  %v725_v17 = vpop.f32.mrf.mxu3 }
 0x29c   :  { %v765_v18 = vadd.f32 %v764_v14, %v763_v16 }
 0x29e   :  { %766 = vadd.xlane.f32.xlu0 %v765_v18 }
 0x2a0   :  { %v744_v19 = vpop.f32.mrf.mxu0  ;;  %v757_v15 = vpop.f32.mrf.mxu1 }
 0x2b2   :  { %1574 = vrot.lane.b32.xlu0 %v1573_v32, %s1681_s11  ;;  %s1696_s11 = smov 8  }
 0x311   :  { %v767_v37 = vpop.xlane.xlu0 %766 }
 0x312   :  { %v775_v38 = vmul.f32 %v2063_v57, %v767_v37 }
 0x314   :  { %v776_v39 = vsub.f32 %v710_v50, %v775_v38  ;;  %v777_v40 = vsub.f32 %v723_v31, %v775_v38  ;;  %v778_v35 = vsub.f32 %v742_v9, %v775_v38  ;;  %v779_v42 = vsub.f32 %v755_v10, %v775_v38 }
 0x316   :  { %v780_v27 = vmul.f32 %v776_v39, %v776_v39  ;;  %v781_v48 = vmul.f32 %v777_v40, %v777_v40  ;;  %v782_v25 = vmul.f32 %v778_v35, %v778_v35  ;;  %v783_v28 = vmul.f32 %v779_v42, %v779_v42 }
 0x318   :  { %v784_v49 = vsel %vm170_vm1, %v780_v27, 0.0  ;;  %v785_v45 = vsel %vm170_vm1, %v781_v48, 0.0  ;;  %v787_v52 = vsel %vm170_vm1, %v782_v25, 0.0  ;;  %v789_v55 = vsel %vm170_vm1, %v783_v28, 0.0 }
 0x319   :  { %v786_v44 = vadd.f32 %v785_v45, %v784_v49 }
 0x31b   :  { %v788_v23 = vadd.f32 %v787_v52, %v786_v44 }
 0x31d   :  { %v790_v58 = vadd.f32 %v789_v55, %v788_v23 }
 0x31f   :  { %791 = vadd.xlane.f32.xlu1 %v790_v58 }
 0x338   :  { %1579 = vrot.lane.b32.xlu1 %v1573_v32, %s1678_s26 }
 0x392   :  { %v792_v53 = vpop.xlane.xlu1 %791 }
 0x393   :  { %v793_v51 = vmul.f32 %v792_v53, %v2063_v57 }
 0x395   :  { %v794_v60 = vadd.f32 1e-05, %v793_v51 }
 0x397   :  { %1591 = vrsqrt.f32 %v794_v60  ;;  %vm801_vm11 = vweird.f32 %v794_v60 }
 0x39d   :  { %v1592_v43 = vpop.eup %1591 }
 0x39e   :  { %v796_v47 = vmul.f32 %v1592_v43, %v794_v60  ;;  %vm802_vm9 = vweird.f32 %v1592_v43  ;;  %v1575_v60 = vpop.permute.xlu0 %1574 }
 0x39f   :  { %vm803_vm2 = vmor %vm801_vm11, %vm802_vm9  ;;  %vm1339_vm11 = vcmask 293888  }
 0x3a0   :  { %v797_v62 = vmul.f32 %v1592_v43, %v796_v47 }
 0x3a2   :  { %v798_v54 = vmul.f32 0.5, %v797_v62 }
 0x3a4   :  { %v799_v63 = vsub.f32 1.5, %v798_v54 }
 0x3a6   :  { %v800_v0 = vmul.f32 %v1592_v43, %v799_v63  ;;  %v1577_v63 = vunpack.i.h.bf16 %v1575_v60 }
 0x3a8   :  { %v804_v2 = vsel %vm803_vm2, %v1592_v43, %v800_v0  ;;  %vm2395_vm2 = vcmask 1031168  }
 0x3a9   :  { %v806_v3 = vmul.f32 %v805_v1, %v804_v2  ;;  %vm2398_vm9 = vmmov %vm2395_vm2 }
 0x3ab   :  { %809 = vperm.xlu2 %1562, %v806_v3   ;;  %v1572_v3 = vunpack.i.h.bf16 %v2077_v46 }
 0x405   :  { %v810_v30 = vpop.permute.xlu2 %809 }
 0x406   :  { %v812_v50 = vmul.f32 %v810_v30, %v776_v39  ;;  %v813_v31 = vmul.f32 %v810_v30, %v777_v40  ;;  %v814_v6 = vmul.f32 %v810_v30, %v778_v35  ;;  %v815_v7 = vmul.f32 %v810_v30, %v779_v42 }
 0x408   :  { %v822_v8 = vadd.f32 %v820_v4, %v812_v50  ;;  %v823_v9 = vadd.f32 %v820_v4, %v813_v31  ;;  %v824_v16 = vadd.f32 %v820_v4, %v814_v6  ;;  %v825_v34 = vadd.f32 %v820_v4, %v815_v7 }
 0x409   :  { %v2123_v50 = vunpack.i.l.bf16 %v2077_v46 }
 0x40a   :  { %v826_v10 = vmax.f32 %v822_v8, 0.0  ;;  %v827_v13 = vmax.f32 %v823_v9, 0.0  ;;  %v828_v17 = vmax.f32 %v824_v16, 0.0  ;;  %v829_v18 = vmax.f32 %v825_v34, 0.0 }
 0x40b   :  { %v984_v46 = vsel %vm353_vm14, %v2123_v50, %v1572_v3  ;;  %vm2392_vm14 = vcmask 785408  }
 0x40c   :  { %v830_v14 = vpack.c.bf16 %v827_v13, %v826_v10  ;;  %v831_v19 = vpack.c.bf16 %v829_v18, %v828_v17 }
 0x40e   :  { %834 = vrot.lane.b32.xlu2 %v830_v14, %s1679_s27 }
 0x416   :  { %836 = vrot.lane.b32.xlu2 %v831_v19, %s1679_s27 }
 0x468   :  { %v835_v15 = vpop.permute.xlu2 %834 }
 0x469   :  { %v838_v22 = vrot.slane %v835_v15, 4 }
 0x46b   :  { %v840_v29 = vsel %vm91_vm5, %v838_v22, %v835_v15  ;;  %847 = vst.msk [vmem:[#allocation2 + $0x8] sm:$0x3] %vm102_vm6, %v838_v22  ;;  %v1576_v22 = vunpack.i.l.bf16 %v1575_v60 }
 0x46c   :  { %846 = vst.msk [vmem:[#allocation2] sm:$0x33] %vm1789_vm7, %v840_v29 }
 0x470   :  { %v837_v12 = vpop.permute.xlu2 %836 }
 0x471   :  { %v839_v11 = vrot.slane %v837_v12, 4 }
 0x472   :  { %v915_v32 = vld [vmem:[#allocation2 + $0x8] sm:$0x3] }
 0x473   :  { %v841_v24 = vsel %vm91_vm5, %v839_v11, %v837_v12  ;;  %849 = vst.msk [vmem:[#allocation2 + $0x14] sm:$0x3] %vm102_vm6, %v839_v11  ;;  %v1122_v33 = vunpack.c.l.b16 %v915_v32  ;;  %v914_v36 = vld [vmem:[#allocation2] sm:$0x33]  ;;  %v2102_v49 = vld [vmem:[#allocation2 + $0x8] sm:$0x3]  ;;  %v2125_v31 = vunpack.c.l.bf16 %v915_v32 }
 0x474   :  { %848 = vst.msk [vmem:[#allocation2 + $0xc] sm:$0x33] %vm1789_vm7, %v841_v24  ;;  %v1121_v21 = vunpack.c.h.b16 %v914_v36  ;;  %v1120_v25 = vunpack.c.l.b16 %v914_v36  ;;  %v1014_v52 = vunpack.c.l.b16 %v2102_v49  ;;  %v2109_v53 = vld [vmem:[#allocation2] sm:$0x33]  ;;  %v2128_v8 = vunpack.c.l.bf16 %v914_v36 }
 0x475   :  { %v1128_v56 = vpack.c.b16 %v1122_v33, %v1122_v33  ;;  %v1013_v54 = vunpack.c.h.b16 %v2109_v53  ;;  %v1012_v30 = vunpack.c.l.b16 %v2109_v53  ;;  %v2130_v9 = vunpack.c.h.bf16 %v914_v36 }
 0x476   :  { %v1127_v20 = vpack.c.b16 %v1121_v21, %v1121_v21  ;;  %v1126_v45 = vpack.c.b16 %v1120_v25, %v1120_v25  ;;  %v1020_v58 = vpack.c.b16 %v1014_v52, %v1014_v52  ;;  %v990_v34 = vmul.f32 %v1572_v3, %v2125_v31 }
 0x477   :  { %1136 = vrot.lane.b32.xlu2 %v1128_v56, %s1686_s15  ;;  %v1220_v44 = vrot.slane %v1128_v56, 2  ;;  %v1019_v0 = vpack.c.b16 %v1013_v54, %v1013_v54  ;;  %v1018_v14 = vpack.c.b16 %v1012_v30, %v1012_v30  ;;  %v988_v18 = vmul.f32 %v2123_v50, %v2128_v8 }
 0x478   :  { %1134 = vrot.lane.b32.xlu0 %v1127_v20, %s1686_s15  ;;  %v1026_v43 = vrot.slane %v1020_v58, 6  ;;  %v1219_v62 = vrot.slane %v1127_v20, 2  ;;  %v1218_v4 = vrot.slane %v1126_v45, 2  ;;  %v989_v19 = vmul.f32 %v984_v46, %v2130_v9 }
 0x479   :  { %v1025_v10 = vrot.slane %v1019_v0, 6  ;;  %v1024_v15 = vrot.slane %v1018_v14, 6  ;;  %v995_v12 = vpack.c.bf16 %v990_v34, %v990_v34  ;;  %v966_v24 = vsel %vm334_vm12, %v1576_v22, %v1577_v63 }
 0x47a   :  { %v917_v37 = vld [vmem:[#allocation2 + $0x14] sm:$0x3]  ;;  %v994_v32 = vpack.c.bf16 %v989_v19, %v988_v18  ;;  %v972_v36 = vmul.f32 %v1577_v63, %v2125_v31  ;;  %v970_v56 = vmul.f32 %v1576_v22, %v2128_v8  ;;  %v971_v20 = vmul.f32 %v966_v24, %v2130_v9 }
 0x47b   :  { %v1125_v38 = vunpack.c.l.b16 %v917_v37  ;;  %v2093_v39 = vld [vmem:[#allocation2 + $0xc] sm:$0x33]  ;;  %v2096_v35 = vld [vmem:[#allocation2 + $0x14] sm:$0x3]  ;;  %v2111_v47 = vunpack.c.l.bf16 %v917_v37  ;;  %v1246_v33 = vunpack.c.l.b16 %v995_v12  ;;  %v2149_v37 = vunpack.i.h.bf16 %v2079_v61 }
 0x47c   :  { %v1123_v40 = vunpack.c.l.b16 %v2093_v39  ;;  %v1017_v48 = vunpack.c.l.b16 %v2096_v35  ;;  %v1124_v55 = vunpack.c.h.b16 %v2093_v39  ;;  %v2117_v1 = vld [vmem:[#allocation2 + $0xc] sm:$0x33]  ;;  %v1245_v21 = vunpack.c.h.b16 %v994_v32 }
 0x47d   :  { %v1131_v42 = vpack.c.b16 %v1125_v38, %v1125_v38  ;;  %v975_v2 = vmul.f32 %v1577_v63, %v2111_v47  ;;  %v1015_v7 = vunpack.c.l.b16 %v2117_v1  ;;  %v2164_v63 = vunpack.c.l.bf16 %v2093_v39 }
 0x47e   :  { %v1129_v27 = vpack.c.b16 %v1123_v40, %v1123_v40  ;;  %v1023_v28 = vpack.c.b16 %v1017_v48, %v1017_v48  ;;  %v1130_v51 = vpack.c.b16 %v1124_v55, %v1124_v55  ;;  %v1016_v40 = vunpack.c.h.b16 %v2117_v1 }
 0x47f   :  { %1142 = vrot.lane.b32.xlu1 %v1131_v42, %s1686_s15  ;;  %v1223_v59 = vrot.slane %v1131_v42, 2  ;;  %v979_v13 = vpack.c.bf16 %v975_v2, %v975_v2  ;;  %v1021_v16 = vpack.c.b16 %v1015_v7, %v1015_v7  ;;  %v1586_v42 = vunpack.i.l.bf16 %v2079_v61 }
 0x480   :  { %1138 = vrot.lane.b32.xlu2 %v1129_v27, %s1686_s15  ;;  %v1029_v23 = vrot.slane %v1023_v28, 6  ;;  %v1221_v6 = vrot.slane %v1129_v27, 2  ;;  %v1222_v38 = vrot.slane %v1130_v51, 2  ;;  %v888_v27 = vunpack.c.l.bf16 %v2102_v49 }
 0x481   :  { %1234 = vrot.lane.b32.xlu0 %v1223_v59, %s1685_s14  ;;  %v1195_v17 = vunpack.c.l.b16 %v979_v13  ;;  %v1027_v29 = vrot.slane %v1021_v16, 6  ;;  %v1252_v59 = vpack.c.b16 %v1246_v33, %v1246_v33  ;;  %v977_v48 = vpack.c.bf16 %v972_v36, %v972_v36 }
 0x482   :  { %v1251_v25 = vpack.c.b16 %v1245_v21, %v1245_v21  ;;  %v976_v28 = vpack.c.bf16 %v971_v20, %v970_v56  ;;  %v1022_v52 = vpack.c.b16 %v1016_v40, %v1016_v40  ;;  %v900_v61 = vsel %vm265_vm0, %v1586_v42, %v2149_v37  ;;  %vm2394_vm0 = vmmov %vm2392_vm14 }
 0x483   :  { %v1201_v11 = vpack.c.b16 %v1195_v17, %v1195_v17  ;;  %v1192_v49 = vunpack.c.l.b16 %v977_v48  ;;  %v906_v55 = vmul.f32 %v2149_v37, %v888_v27  ;;  %v2167_v0 = vunpack.c.h.bf16 %v2093_v39 }
 0x484   :  { %v1191_v58 = vunpack.c.h.b16 %v976_v28  ;;  %v991_v7 = vmul.f32 %v2123_v50, %v2164_v63  ;;  %v1190_v34 = vunpack.c.l.b16 %v976_v28  ;;  %v1244_v17 = vunpack.c.l.b16 %v994_v32  ;;  %v1580_v28 = vpop.permute.xlu1 %1579 }
 0x485   :  { %v1198_v54 = vpack.c.b16 %v1192_v49, %v1192_v49  ;;  %v973_v18 = vmul.f32 %v1576_v22, %v2164_v63  ;;  %v974_v19 = vmul.f32 %v966_v24, %v2167_v0  ;;  %v1567_v50 = vunpack.i.h.bf16 %v2075_v5 }
 0x486   :  { %v1197_v2 = vpack.c.b16 %v1191_v58, %v1191_v58  ;;  %v890_v33 = vunpack.c.h.bf16 %v2117_v1  ;;  %v1566_v32 = vunpack.i.l.bf16 %v2075_v5  ;;  %vm2389_vm5 = vcmask 777216  }
 0x487   :  { %1132 = vrot.lane.b32.xlu1 %v1126_v45, %s1686_s15  ;;  %v886_v45 = vunpack.c.l.bf16 %v2109_v53  ;;  %v978_v12 = vpack.c.bf16 %v974_v19, %v973_v18  ;;  %v957_v21 = vmul.f32 %v1567_v50, %v2111_v47  ;;  %vm2390_vm6 = vmmov %vm2389_vm5  ;;  %vm1272_vm12 = vcmask 1041408  }
 0x488   :  { %1228 = vrot.lane.b32.xlu2 %v1220_v44, %s1685_s14  ;;  %v887_v44 = vunpack.c.h.bf16 %v2109_v53  ;;  %v911_v53 = vpack.c.bf16 %v906_v55, %v906_v55  ;;  %v908_v20 = vmul.f32 %v900_v61, %v890_v33  ;;  %v955_v18 = vmul.f32 %v1566_v32, %v2164_v63  ;;  %vm2391_vm7 = vmmov %vm2389_vm5 }
 0x489   :  { %1040 = vrot.lane.b32.xlu0 %v1029_v23, %s1687_s16  ;;  %v993_v23 = vmul.f32 %v1572_v3, %v2111_v47  ;;  %v1194_v24 = vunpack.c.h.b16 %v978_v12  ;;  %v961_v40 = vpack.c.bf16 %v957_v21, %v957_v21 }
 0x48a   :  { %v905_v60 = vmul.f32 %v900_v61, %v887_v44  ;;  %v1052_v30 = vunpack.c.l.b16 %v911_v53  ;;  %v1581_v61 = vunpack.i.l.bf16 %v1580_v28 }
 0x48b   :  { %v1157_v44 = vunpack.c.l.b16 %v961_v40 }
 0x48c   :  { %v1058_v14 = vpack.c.b16 %v1052_v30, %v1052_v30 }
 0x48d   :  { %v1163_v58 = vpack.c.b16 %v1157_v44, %v1157_v44 }
 0x48f   :  { %1140 = vrot.lane.b32.xlu1 %v1130_v51, %s1686_s15  ;;  %v904_v51 = vmul.f32 %v1586_v42, %v886_v45 }
 0x490   :  { %1034 = vrot.lane.b32.xlu2 %v1026_v43, %s1687_s16  ;;  %v1028_v43 = vrot.slane %v1022_v52, 6  ;;  %v952_v52 = vmul.f32 %v1566_v32, %v2128_v8 }
 0x491   :  { %1226 = vrot.lane.b32.xlu0 %v1219_v62, %s1685_s14  ;;  %v997_v62 = vpack.c.bf16 %v993_v23, %v993_v23  ;;  %v910_v3 = vpack.c.bf16 %v905_v60, %v904_v51  ;;  %v1582_v23 = vunpack.i.h.bf16 %v1580_v28 }
 0x493   :  { %v1050_v22 = vunpack.c.l.b16 %v910_v3  ;;  %v936_v53 = vmul.f32 %v1582_v23, %v2125_v31 }
 0x495   :  { %v1056_v27 = vpack.c.b16 %v1050_v22, %v1050_v22 }
 0x497   :  { %1224 = vrot.lane.b32.xlu1 %v1218_v4, %s1685_s14  ;;  %v1249_v4 = vunpack.c.l.b16 %v997_v62 }
 0x498   :  { %1230 = vrot.lane.b32.xlu2 %v1221_v6, %s1685_s14  ;;  %v1051_v6 = vunpack.c.h.b16 %v910_v3 }
 0x499   :  { %1032 = vrot.lane.b32.xlu0 %v1025_v10, %s1687_s16  ;;  %v992_v10 = vmul.f32 %v984_v46, %v2167_v0  ;;  %v1255_v13 = vpack.c.b16 %v1249_v4, %v1249_v4  ;;  %v1196_v46 = vpack.c.b16 %v1190_v34, %v1190_v34  ;;  %v934_v4 = vmul.f32 %v1581_v61, %v2128_v8 }
 0x49a   :  { %v1057_v39 = vpack.c.b16 %v1051_v6, %v1051_v6 }
 0x49b   :  { %v996_v16 = vpack.c.bf16 %v992_v10, %v991_v7 }
 0x49f   :  { %1030 = vrot.lane.b32.xlu1 %v1024_v15, %s1687_s16  ;;  %v1248_v15 = vunpack.c.h.b16 %v996_v16 }
 0x4a0   :  { %1036 = vrot.lane.b32.xlu2 %v1027_v29, %s1687_s16  ;;  %v1250_v29 = vpack.c.b16 %v1244_v17, %v1244_v17 }
 0x4a1   :  { %1212 = vrot.lane.b32.xlu0 %v1201_v11, %s1688_s17  ;;  %v889_v11 = vunpack.c.l.bf16 %v2117_v1  ;;  %v1254_v36 = vpack.c.b16 %v1248_v15, %v1248_v15  ;;  %v948_v1 = vsel %vm315_vm15, %v1566_v32, %v1567_v50  ;;  %vm2393_vm15 = vmmov %vm2389_vm5 }
 0x4a2   :  { %v953_v5 = vmul.f32 %v948_v1, %v2130_v9  ;;  %v956_v8 = vmul.f32 %v948_v1, %v2167_v0 }
 0x4a3   :  { %v907_v56 = vmul.f32 %v1586_v42, %v889_v11  ;;  %v1247_v42 = vunpack.c.l.b16 %v996_v16 }
 0x4a4   :  { %v958_v51 = vpack.c.bf16 %v953_v5, %v952_v52 }
 0x4a5   :  { %v912_v48 = vpack.c.bf16 %v908_v20, %v907_v56  ;;  %v1253_v60 = vpack.c.b16 %v1247_v42, %v1247_v42 }
 0x4a6   :  { %v1153_v3 = vunpack.c.h.b16 %v958_v51 }
 0x4a7   :  { %1232 = vrot.lane.b32.xlu1 %v1222_v38, %s1685_s14  ;;  %v1193_v38 = vunpack.c.l.b16 %v978_v12  ;;  %v1053_v49 = vunpack.c.l.b16 %v912_v48  ;;  %v1054_v7 = vunpack.c.h.b16 %v912_v48 }
 0x4a8   :  { %1260 = vrot.lane.b32.xlu2 %v1252_v59, %s1690_s19  ;;  %v1200_v59 = vpack.c.b16 %v1194_v24, %v1194_v24  ;;  %v891_v24 = vunpack.c.l.bf16 %v2096_v35  ;;  %v939_v35 = vmul.f32 %v1582_v23, %v2111_v47 }
 0x4a9   :  { %1258 = vrot.lane.b32.xlu0 %v1251_v25, %s1690_s19  ;;  %v954_v25 = vmul.f32 %v1567_v50, %v2125_v31  ;;  %v1199_v45 = vpack.c.b16 %v1193_v38, %v1193_v38  ;;  %v1059_v62 = vpack.c.b16 %v1053_v49, %v1053_v49  ;;  %v1060_v16 = vpack.c.b16 %v1054_v7, %v1054_v7 }
 0x4aa   :  { %v1152_v31 = vunpack.c.l.b16 %v958_v51  ;;  %v943_v49 = vpack.c.bf16 %v939_v35, %v939_v35  ;;  %v850_v35 = vld [vmem:[#allocation2] sm:$0x33] }
 0x4ab   :  { %v959_v55 = vpack.c.bf16 %v954_v25, %v954_v25 }
 0x4ac   :  { %v1158_v15 = vpack.c.b16 %v1152_v31, %v1152_v31  ;;  %v1087_v47 = vunpack.c.l.b16 %v943_v49 }
 0x4ae   :  { %v1164_v11 = vrot.slane %v1158_v15, 6 }
 0x4af   :  { %1038 = vrot.lane.b32.xlu1 %v1028_v43, %s1687_s16  ;;  %v930_v43 = vsel %vm296_vm13, %v1581_v61, %v1582_v23  ;;  %vm1293_vm13 = vcmask 1045504  }
 0x4b0   :  { %1206 = vrot.lane.b32.xlu2 %v1198_v54, %s1688_s17  ;;  %v1154_v54 = vunpack.c.l.b16 %v959_v55  ;;  %v935_v30 = vmul.f32 %v930_v43, %v2130_v9  ;;  %v938_v21 = vmul.f32 %v930_v43, %v2167_v0 }
 0x4b1   :  { %1204 = vrot.lane.b32.xlu0 %v1197_v2, %s1688_s17  ;;  %v1169_v2 = vrot.slane %v1163_v58, 6 }
 0x4b2   :  { %v1160_v10 = vpack.c.b16 %v1154_v54, %v1154_v54 }
 0x4b4   :  { %v1166_v34 = vrot.slane %v1160_v10, 6 }
 0x4b7   :  { %1266 = vrot.lane.b32.xlu1 %v1255_v13, %s1690_s19  ;;  %v941_v13 = vpack.c.bf16 %v936_v53, %v936_v53 }
 0x4b8   :  { %1066 = vrot.lane.b32.xlu2 %v1058_v14, %s1692_s21  ;;  %v1159_v14 = vpack.c.b16 %v1153_v3, %v1153_v3 }
 0x4b9   :  { %1064 = vrot.lane.b32.xlu0 %v1057_v39, %s1692_s21  ;;  %v940_v39 = vpack.c.bf16 %v935_v30, %v934_v4  ;;  %v1084_v17 = vunpack.c.l.b16 %v941_v13 }
 0x4ba   :  { %v1165_v9 = vrot.slane %v1159_v14, 6 }
 0x4bb   :  { %v1083_v19 = vunpack.c.h.b16 %v940_v39  ;;  %v1082_v33 = vunpack.c.l.b16 %v940_v39 }
 0x4bd   :  { %v1089_v12 = vpack.c.b16 %v1083_v19, %v1083_v19  ;;  %v1088_v38 = vpack.c.b16 %v1082_v33, %v1082_v33 }
 0x4bf   :  { %1202 = vrot.lane.b32.xlu1 %v1196_v46, %s1688_s17  ;;  %v1090_v46 = vpack.c.b16 %v1084_v17, %v1084_v17  ;;  %v1095_v56 = vrot.slane %v1089_v12, 2  ;;  %v1094_v0 = vrot.slane %v1088_v38, 2 }
 0x4c0   :  { %1256 = vrot.lane.b32.xlu2 %v1250_v29, %s1690_s19  ;;  %v960_v29 = vpack.c.bf16 %v956_v8, %v955_v18 }
 0x4c1   :  { %1264 = vrot.lane.b32.xlu0 %v1254_v36, %s1690_s19  ;;  %v937_v36 = vmul.f32 %v1581_v61, %v2164_v63  ;;  %v1096_v22 = vrot.slane %v1090_v46, 2  ;;  %v909_v63 = vmul.f32 %v2149_v37, %v891_v24 }
 0x4c2   :  { %v1156_v32 = vunpack.c.h.b16 %v960_v29  ;;  %v1155_v20 = vunpack.c.l.b16 %v960_v29 }
 0x4c3   :  { %v942_v40 = vpack.c.bf16 %v938_v21, %v937_v36  ;;  %v913_v44 = vpack.c.bf16 %v909_v63, %v909_v63 }
 0x4c4   :  { %v1162_v1 = vpack.c.b16 %v1156_v32, %v1156_v32 }
 0x4c5   :  { %v1086_v48 = vunpack.c.h.b16 %v942_v40  ;;  %v1085_v28 = vunpack.c.l.b16 %v942_v40  ;;  %v1055_v55 = vunpack.c.l.b16 %v913_v44  ;;  %v862_v44 = vunpack.c.h.bf16 %v850_v35 }
 0x4c6   :  { %v1168_v25 = vrot.slane %v1162_v1, 6 }
 0x4c7   :  { %1062 = vrot.lane.b32.xlu1 %v1056_v27, %s1692_s21  ;;  %v1092_v52 = vpack.c.b16 %v1086_v48, %v1086_v48  ;;  %v1091_v61 = vpack.c.b16 %v1085_v28, %v1085_v28  ;;  %v1061_v23 = vpack.c.b16 %v1055_v55, %v1055_v55 }
 0x4c8   :  { %1210 = vrot.lane.b32.xlu2 %v1200_v59, %s1688_s17  ;;  %v1161_v59 = vpack.c.b16 %v1155_v20, %v1155_v20 }
 0x4c9   :  { %1208 = vrot.lane.b32.xlu0 %v1199_v45, %s1688_s17  ;;  %v1098_v58 = vrot.slane %v1092_v52, 2  ;;  %v1097_v51 = vrot.slane %v1091_v61, 2 }
 0x4ca   :  { %v1167_v45 = vrot.slane %v1161_v59, 6 }
 0x4cf   :  { %1262 = vrot.lane.b32.xlu1 %v1253_v60, %s1690_s19 }
 0x4d0   :  { %1068 = vrot.lane.b32.xlu2 %v1059_v62, %s1692_s21  ;;  %v1093_v62 = vpack.c.b16 %v1087_v47, %v1087_v47 }
 0x4d1   :  { %v1137_v6 = vpop.permute.xlu2 %1136  ;;  %1180 = vrot.lane.b32.xlu0 %v1169_v2, %s1691_s20 }
 0x4d2   :  { %v1099_v53 = vrot.slane %v1093_v62, 2 }
 0x4d7   :  { %1070 = vrot.lane.b32.xlu1 %v1060_v16, %s1692_s21 }
 0x4d8   :  { %1174 = vrot.lane.b32.xlu2 %v1166_v34, %s1691_s20 }
 0x4d9   :  { %1172 = vrot.lane.b32.xlu0 %v1165_v9, %s1691_s20 }
 0x4da   :  { %v1139_v50 = vpop.permute.xlu2 %1138 }
 0x4df   :  { %1170 = vrot.lane.b32.xlu1 %v1164_v11, %s1691_s20 }
 0x4e0   :  { %1104 = vrot.lane.b32.xlu2 %v1096_v22, %s1689_s18 }
 0x4e1   :  { %1102 = vrot.lane.b32.xlu0 %v1095_v56, %s1689_s18 }
 0x4e2   :  { %v1229_v27 = vpop.permute.xlu2 %1228 }
 0x4e7   :  { %1100 = vrot.lane.b32.xlu1 %v1094_v0, %s1689_s18 }
 0x4e8   :  { %1178 = vrot.lane.b32.xlu2 %v1168_v25, %s1691_s20 }
 0x4e9   :  { %1176 = vrot.lane.b32.xlu0 %v1167_v45, %s1691_s20  ;;  %v861_v45 = vunpack.c.l.bf16 %v850_v35 }
 0x4ea   :  { %v1035_v5 = vpop.permute.xlu2 %1034  ;;  %v1135_v42 = vpop.permute.xlu0 %1134 }
 0x4eb   :  { %v2219_v37 = vsel %vm505_vm3, %v1135_v42, %v1137_v6 }
 0x4ef   :  { %1108 = vrot.lane.b32.xlu1 %v1098_v58, %s1689_s18  ;;  %v867_v58 = vmul.f32 %v2056_v26, %v861_v45 }
 0x4f0   :  { %1106 = vrot.lane.b32.xlu2 %v1097_v51, %s1689_s18  ;;  %v868_v51 = vmul.f32 %v2058_v41, %v862_v44 }
 0x4f1   :  { %v1143_v60 = vpop.permute.xlu1 %1142  ;;  %1072 = vrot.lane.b32.xlu0 %v1061_v23, %s1692_s21 }
 0x4f2   :  { %v1231_v43 = vpop.permute.xlu2 %1230 }
 0x4f3   :  { %v2224_v54 = vpop.permute.xlu0 %1234 }
 0x4f8   :  { %1110 = vrot.lane.b32.xlu2 %v1099_v53, %s1689_s18  ;;  %v871_v53 = vpack.c.bf16 %v868_v51, %v867_v58 }
 0x4f9   :  { %v1133_v2 = vpop.permute.xlu1 %1132 }
 0x4fa   :  { %v2228_v3 = vsel %vm505_vm3, %v1133_v2, %v1135_v42  ;;  %v2230_v4 = vpop.permute.xlu2 %1036 }
 0x4fb   :  { %v1041_v30 = vpop.permute.xlu0 %1040 }
 0x501   :  { %v1141_v6 = vpop.permute.xlu1 %1140 }
 0x502   :  { %v2233_v7 = vsel %vm505_vm3, %v1139_v50, %v1141_v6  ;;  %v1147_v10 = vsel %vm505_vm3, %v1141_v6, %v1143_v60  ;;  %v1261_v13 = vpop.permute.xlu2 %1260  ;;  %vm2396_vm3 = vmmov %vm2394_vm0 }
 0x503   :  { %v1227_v14 = vpop.permute.xlu0 %1226 }
 0x504   :  { %v2237_v39 = vsel %vm2389_vm5, %v1227_v14, %v1229_v27 }
 0x509   :  { %v1225_v16 = vpop.permute.xlu1 %1224 }
 0x50a   :  { %v2240_v31 = vsel %vm2390_vm6, %v1225_v16, %v1227_v14  ;;  %v1207_v34 = vpop.permute.xlu2 %1206  ;;  %v1001_v14 = vunpack.c.h.b16 %v871_v53  ;;  %vm2400_vm6 = vmmov %vm2394_vm0 }
 0x50b   :  { %v1033_v17 = vpop.permute.xlu0 %1032 }
 0x50c   :  { %v2243_v18 = vsel %vm406_vm4, %v1033_v17, %v1035_v5 }
 0x511   :  { %v1031_v8 = vpop.permute.xlu1 %1030 }
 0x512   :  { %v2246_v9 = vsel %vm406_vm4, %v1031_v8, %v1033_v17  ;;  %v2248_v19 = vpop.permute.xlu2 %1066 }
 0x513   :  { %v1213_v15 = vpop.permute.xlu0 %1212 }
 0x519   :  { %v1233_v50 = vpop.permute.xlu1 %1232 }
 0x51a   :  { %v2251_v46 = vsel %vm2391_vm7, %v1231_v43, %v1233_v50  ;;  %v1257_v29 = vpop.permute.xlu2 %1256  ;;  %v1239_v60 = vsel %vm2393_vm15, %v1233_v50, %v2224_v54  ;;  %v1005_v50 = vpack.c.b16 %v1001_v14, %v1001_v14  ;;  %vm2401_vm7 = vmmov %vm2395_vm2 }
 0x51b   :  { %v1259_v12 = vpop.permute.xlu0 %1258 }
 0x51c   :  { %v1268_v11 = vsel %vm621_vm8, %v1257_v29, %v1259_v12  ;;  %v1269_v33 = vsel %vm621_vm8, %v1259_v12, %v1261_v13 }
 0x51d   :  { %v1344_v36 = vsel %vm1272_vm12, %v1268_v11, 0  ;;  %v1347_v21 = vsel %vm1272_vm12, %v1269_v33, 0  ;;  %v1000_v11 = vunpack.c.l.b16 %v871_v53 }
 0x51e   :  { %1354 = vmatpush.bf16.msrb.mxu2 %v1344_v36  ;;  %1367 = vmatpush.bf16.msrb.mxu3 %v1347_v21 }
 0x521   :  { %v2257_v22 = vpop.permute.xlu1 %1038 }
 0x522   :  { %v2261_v32 = vsel %vm406_vm4, %v2257_v22, %v1041_v30  ;;  %v2263_v24 = vpop.permute.xlu2 %1210  ;;  %v851_v30 = vld [vmem:[#allocation2 + $0xc] sm:$0x33] }
 0x523   :  { %v1205_v56 = vpop.permute.xlu0 %1204  ;;  %v1217_v47 = vsel %vm2392_vm14, %v2263_v24, %v1213_v15  ;;  %v863_v17 = vunpack.c.l.bf16 %v851_v30  ;;  %v864_v8 = vunpack.c.h.bf16 %v851_v30 }
 0x524   :  { %v1215_v16 = vsel %vm2394_vm0, %v1205_v56, %v1207_v34 }
 0x525   :  { %v869_v34 = vmul.f32 %v2056_v26, %v863_v17  ;;  %v870_v36 = vmul.f32 %v2058_v41, %v864_v8  ;;  %v1338_v41 = vld [vmem:[%s2379_s7] sm:$0x3] }
 0x529   :  { %v1267_v20 = vpop.permute.xlu1 %1266 }
 0x52a   :  { %v2265_v38 = vpop.permute.xlu2 %1068 }
 0x52b   :  { %v2267_v40 = vpop.permute.xlu0 %1064 }
 0x52c   :  { %v1075_v29 = vsel %vm2395_vm2, %v2267_v40, %v2248_v19 }
 0x531   :  { %v1203_v27 = vpop.permute.xlu1 %1202 }
 0x532   :  { %v1175_v1 = vpop.permute.xlu2 %1174  ;;  %v1214_v21 = vsel %vm2396_vm3, %v1203_v27, %v1205_v56 }
 0x533   :  { %v1265_v59 = vpop.permute.xlu0 %1264 }
 0x534   :  { %v1271_v63 = vsel %vm621_vm8, %v1265_v59, %v1267_v20 }
 0x535   :  { %v1379_v0 = vsel %vm1272_vm12, %v1271_v63, 0 }
 0x536   :  { %1399 = vmatpush.bf16.msra.mxu1 %v1379_v0 }
 0x539   :  { %v1063_v48 = vpop.permute.xlu1 %1062 }
 0x53a   :  { %v1105_v25 = vpop.permute.xlu2 %1104  ;;  %v1074_v56 = vsel %vm2398_vm9, %v1063_v48, %v2267_v40 }
 0x53b   :  { %v2271_v28 = vpop.permute.xlu0 %1208 }
 0x53c   :  { %v1216_v40 = vsel %vm2400_vm6, %v2271_v28, %v2263_v24 }
 0x541   :  { %v1263_v52 = vpop.permute.xlu1 %1262 }
 0x542   :  { %v1270_v5 = vsel %vm621_vm8, %v1263_v52, %v1265_v59  ;;  %v1179_v42 = vpop.permute.xlu2 %1178  ;;  %vm2397_vm8 = vcmask 916480  }
 0x543   :  { %v1376_v61 = vsel %vm1272_vm12, %v1270_v5, 0  ;;  %v1181_v49 = vpop.permute.xlu0 %1180  ;;  %vm2399_vm5 = vmmov %vm2397_vm8 }
 0x544   :  { %v1185_v55 = vsel %vm538_vm10, %v1179_v42, %v1181_v49  ;;  %1386 = vmatpush.bf16.msra.mxu0 %v1376_v61  ;;  %v1044_v61 = vsel %vm406_vm4, %v2230_v4, %v2257_v22  ;;  %vm2403_vm4 = vmmov %vm2395_vm2 }
 0x545   :  { %v1317_v23 = vsel %vm1272_vm12, %v1147_v10, %v1185_v55  ;;  %vm2404_vm14 = vmmov %vm2399_vm5 }
 0x546   :  { %v1325_v43 = vsel %vm170_vm1, %v1317_v23, %v1217_v47 }
 0x547   :  { %v1336_v62 = vsel %vm1293_vm13, %v1325_v43, %v1239_v60 }
 0x548   :  { %1400 = vmatpush.bf16.msra.mxu1 %v1336_v62 }
 0x549   :  { %v2285_v2 = vpop.permute.xlu1 %1070 }
 0x54b   :  { %v1173_v6 = vpop.permute.xlu0 %1172 }
 0x54c   :  { %v1183_v13 = vsel %vm538_vm10, %v1173_v6, %v1175_v1 }
 0x54d   :  { %v1311_v10 = vsel %vm1272_vm12, %v2219_v37, %v1183_v13  ;;  %v1278_v37 = vsel %vm1272_vm12, %v1005_v50, %v2243_v18  ;;  %v872_v18 = vpack.c.bf16 %v870_v36, %v869_v34 }
 0x54e   :  { %v1321_v54 = vsel %vm170_vm1, %v1311_v10, %v1215_v16  ;;  %v1288_v59 = vsel %vm170_vm1, %v1278_v37, %v1075_v29 }
 0x54f   :  { %v1330_v15 = vsel %vm1293_vm13, %v1321_v54, %v2237_v39  ;;  %v1002_v45 = vunpack.c.l.b16 %v872_v18  ;;  %v1003_v48 = vunpack.c.h.b16 %v872_v18 }
 0x550   :  { %1368 = vmatpush.bf16.msrb.mxu3 %v1330_v15 }
 0x551   :  { %v1171_v12 = vpop.permute.xlu1 %1170  ;;  %v1006_v55 = vpack.c.b16 %v1002_v45, %v1002_v45  ;;  %v1007_v58 = vpack.c.b16 %v1003_v48, %v1003_v48 }
 0x552   :  { %v1182_v33 = vsel %vm538_vm10, %v1171_v12, %v1173_v6 }
 0x553   :  { %v1308_v39 = vsel %vm1272_vm12, %v2228_v3, %v1182_v33  ;;  %v1103_v20 = vpop.permute.xlu0 %1102  ;;  %v1004_v3 = vpack.c.b16 %v1000_v11, %v1000_v11 }
 0x554   :  { %v1113_v1 = vsel %vm2397_vm8, %v1103_v20, %v1105_v25  ;;  %v1319_v19 = vsel %vm170_vm1, %v1308_v39, %v1214_v21 }
 0x555   :  { %v1327_v26 = vsel %vm1293_vm13, %v1319_v19, %v2240_v31  ;;  %v1298_v63 = vsel %vm1293_vm13, %v1288_v59, %v1113_v1  ;;  %v1275_v27 = vsel %vm1272_vm12, %v1004_v3, %v2246_v9  ;;  %v1107_v31 = vpop.permute.xlu2 %1106 }
 0x556   :  { %1355 = vmatpush.bf16.msrb.mxu2 %v1327_v26  ;;  %1369 = vmatpush.bf16.msrb.mxu3 %v1298_v63  ;;  %v1286_v35 = vsel %vm170_vm1, %v1275_v27, %v1074_v56 }
 0x559   :  { %v1101_v0 = vpop.permute.xlu1 %1100  ;;  %1510 = vmatmul.msk.bf16.vlgmr.msrb.gmra.mxu3 %vm1339_vm11, %v1338_v41 }
 0x55a   :  { %v1112_v25 = vsel %vm2399_vm5, %v1101_v0, %v1103_v20 }
 0x55b   :  { %v1177_v44 = vpop.permute.xlu0 %1176  ;;  %v1295_v52 = vsel %vm1293_vm13, %v1286_v35, %v1112_v25 }
 0x55c   :  { %v1184_v5 = vsel %vm538_vm10, %v1177_v44, %v1179_v42  ;;  %1356 = vmatpush.bf16.msrb.mxu2 %v1295_v52  ;;  %v1076_v42 = vsel %vm2401_vm7, %v2265_v38, %v2285_v2  ;;  %vm2402_vm10 = vmmov %vm2399_vm5  ;;  %v1284_v38 = vsel %vm1272_vm12, %v1007_v58, %v2261_v32 }
 0x55d   :  { %v1314_v9 = vsel %vm1272_vm12, %v2233_v7, %v1184_v5  ;;  %v1281_v7 = vsel %vm1272_vm12, %v1006_v55, %v1044_v61  ;;  %v1111_v23 = vpop.permute.xlu2 %1110  ;;  %v1446_v5 = vld [vmem:[%s2380_s8] sm:$0xf]  ;;  %s1694_s8 = smov [#allocation8]  }
 0x55e   :  { %v1323_v49 = vsel %vm170_vm1, %v1314_v9, %v1216_v40  ;;  %v1290_v4 = vsel %vm170_vm1, %v1281_v7, %v1076_v42  ;;  %s1487_s0 = sshll.u32 %s1694_s8, 4  ;;  %s1488_s0 = int_to_ptr.vmem [resolvable:$true] %s1487_s0 }
 0x55f   :  { %1509 = vmatmul.msk.bf16.vlgmr.msrb.gmra.mxu2 %vm1339_vm11, %v1338_v41  ;;  %v1333_v24 = vsel %vm1293_vm13, %v1323_v49, %v2251_v46 }
 0x560   :  { %1387 = vmatpush.bf16.msra.mxu0 %v1333_v24 }
 0x561   :  { %v1109_v28 = vpop.permute.xlu1 %1108 }
 0x562   :  { %v1114_v51 = vsel %vm2402_vm10, %v1107_v31, %v1109_v28  ;;  %v1115_v46 = vsel %vm2404_vm14, %v1109_v28, %v1111_v23 }
 0x563   :  { %v1073_v22 = vpop.permute.xlu0 %1072  ;;  %v1301_v47 = vsel %vm1293_vm13, %v1290_v4, %v1114_v51 }
 0x564   :  { %v1077_v60 = vsel %vm2403_vm4, %v2285_v2, %v1073_v22  ;;  %1388 = vmatpush.bf16.msra.mxu0 %v1301_v47 }
 0x565   :  { %v1292_v43 = vsel %vm170_vm1, %v1284_v38, %v1077_v60 }
 0x566   :  { %v1304_v62 = vsel %vm1293_vm13, %v1292_v43, %v1115_v46 }
 0x567   :  { %1511 = vmatmul.msk.bf16.vlgmr.msra.gmra.mxu0 %vm1339_vm11, %v1338_v41  ;;  %1401 = vmatpush.bf16.msra.mxu1 %v1304_v62 }
 0x56a   :  { %1512 = vmatmul.msk.bf16.vlgmr.msra.gmra.mxu1 %vm1339_vm11, %v1338_v41 }
 0x5dc   :  { %v1371_v53 = vpop.f32.mrf.mxu3 }
 0x5dd   :  { %v1408_v30 = vsel %vm170_vm1, %v1371_v53, 0.0 }
 0x5e2   :  { %v1358_v32 = vpop.f32.mrf.mxu2 }
 0x5e3   :  { %v1407_v6 = vsel %vm170_vm1, %v1358_v32, 0.0 }
 0x5e4   :  { %v1409_v13 = vadd.f32 %v1408_v30, %v1407_v6  ;;  %v1390_v2 = vpop.f32.mrf.mxu0  ;;  %v1373_v14 = vpop.f32.mrf.mxu3 }
 0x5e5   :  { %v1410_v16 = vsel %vm170_vm1, %v1390_v2, 0.0 }
 0x5e6   :  { %v1411_v10 = vadd.f32 %v1410_v16, %v1409_v13 }
 0x5e7   :  { %v1403_v17 = vpop.f32.mrf.mxu1 }
 0x5e8   :  { %v1412_v54 = vsel %vm170_vm1, %v1403_v17, 0.0 }
 0x5e9   :  { %v1413_v8 = vadd.f32 %v1412_v54, %v1411_v10 }
 0x5ea   :  { %v1360_v15 = vpop.f32.mrf.mxu2 }
 0x5eb   :  { %1414 = vadd.xlane.f32.xlu1 %v1413_v8 }
 0x5ec   :  { %v1392_v50 = vpop.f32.mrf.mxu0 }
 0x5ef   :  { %v1405_v29 = vpop.f32.mrf.mxu1 }
 0x65e   :  { %v1415_v12 = vpop.xlane.xlu1 %1414 }
 0x65f   :  { %v1416_v11 = vmul.f32 %v1415_v12, %v2063_v57 }
 0x661   :  { %v1417_v34 = vsub.f32 %v1358_v32, %v1416_v11  ;;  %v1418_v33 = vsub.f32 %v1371_v53, %v1416_v11  ;;  %v1419_v37 = vsub.f32 %v1390_v2, %v1416_v11  ;;  %v1420_v36 = vsub.f32 %v1403_v17, %v1416_v11 }
 0x663   :  { %v1421_v21 = vmul.f32 %v1417_v34, %v1417_v34  ;;  %v1422_v39 = vmul.f32 %v1418_v33, %v1418_v33  ;;  %v1423_v20 = vmul.f32 %v1419_v37, %v1419_v37  ;;  %v1424_v1 = vmul.f32 %v1420_v36, %v1420_v36 }
 0x665   :  { %v1425_v19 = vsel %vm170_vm1, %v1421_v21, 0.0  ;;  %v1426_v59 = vsel %vm170_vm1, %v1422_v39, 0.0  ;;  %v1428_v63 = vsel %vm170_vm1, %v1423_v20, 0.0  ;;  %v1430_v3 = vsel %vm170_vm1, %v1424_v1, 0.0 }
 0x666   :  { %v1427_v26 = vadd.f32 %v1426_v59, %v1425_v19 }
 0x668   :  { %v1429_v41 = vadd.f32 %v1428_v63, %v1427_v26 }
 0x66a   :  { %v1431_v18 = vadd.f32 %v1430_v3, %v1429_v41 }
 0x66c   :  { %1432 = vadd.xlane.f32.xlu0 %v1431_v18 }
 0x6df   :  { %v1433_v56 = vpop.xlane.xlu0 %1432 }
 0x6e0   :  { %v1434_v27 = vmul.f32 %v1433_v56, %v2063_v57  ;;  %v1457_v57 = vld [vmem:[%s2381_s9] sm:$0xf]  ;;  %s1695_s9 = smov 128  }
 0x6e2   :  { %v1435_v0 = vadd.f32 1e-05, %v1434_v27 }
 0x6e4   :  { %1593 = vrsqrt.f32 %v1435_v0  ;;  %vm1442_vm13 = vweird.f32 %v1435_v0 }
 0x6ea   :  { %v1594_v31 = vpop.eup %1593 }
 0x6eb   :  { %v1437_v25 = vmul.f32 %v1594_v31, %v1435_v0  ;;  %vm1443_vm12 = vweird.f32 %v1594_v31 }
 0x6ec   :  { %vm1444_vm15 = vmor %vm1442_vm13, %vm1443_vm12 }
 0x6ed   :  { %v1438_v35 = vmul.f32 %v1594_v31, %v1437_v25 }
 0x6ef   :  { %v1439_v45 = vmul.f32 0.5, %v1438_v35 }
 0x6f1   :  { %v1440_v44 = vsub.f32 1.5, %v1439_v45 }
 0x6f3   :  { %v1441_v52 = vmul.f32 %v1594_v31, %v1440_v44 }
 0x6f5   :  { %v1445_v40 = vsel %vm1444_vm15, %v1594_v31, %v1441_v52 }
 0x6f6   :  { %v1447_v9 = vmul.f32 %v1446_v5, %v1445_v40 }
 0x6f8   :  { %1450 = vperm.xlu2 %1562, %v1447_v9  }
 0x700   :  { %1460 = vperm.xlu2 %1562, %v1457_v57  }
 0x752   :  { %v1451_v48 = vpop.permute.xlu2 %1450 }
 0x753   :  { %v1453_v61 = vmul.f32 %v1451_v48, %v1417_v34  ;;  %v1454_v49 = vmul.f32 %v1451_v48, %v1418_v33  ;;  %v1455_v55 = vmul.f32 %v1451_v48, %v1419_v37  ;;  %v1456_v42 = vmul.f32 %v1451_v48, %v1420_v36 }
 0x75a   :  { %v1461_v24 = vpop.permute.xlu2 %1460 }
 0x75b   :  { %v1463_v7 = vadd.f32 %v1461_v24, %v1453_v61  ;;  %v1464_v28 = vadd.f32 %v1461_v24, %v1454_v49  ;;  %v1465_v58 = vadd.f32 %v1461_v24, %v1455_v55  ;;  %v1466_v51 = vadd.f32 %v1461_v24, %v1456_v42 }
 0x75d   :  { %v1468_v4 = vmax.f32 %v1464_v28, 0.0  ;;  %v1470_v22 = vmax.f32 %v1466_v51, 0.0  ;;  %v1467_v47 = vmax.f32 %v1463_v7, 0.0  ;;  %v1469_v38 = vmax.f32 %v1465_v58, 0.0 }
 0x75f   :  { %v1475_v23 = vrot.slane %v1468_v4, 4  ;;  %v1476_v60 = vrot.slane %v1470_v22, 4 }
 0x761   :  { %v1477_v46 = vsel %vm170_vm1, %v1467_v47, %v1475_v23  ;;  %v1478_v43 = vsel %vm170_vm1, %v1469_v38, %v1476_v60 }
 0x762   :  { %1481 = vst [vmem:[#allocation8] sm:$0xff] %v1477_v46 }
 0x763   :  { %1482 = vst [vmem:[#allocation8 + $0x8] sm:$0xff] %v1478_v43 }
 0x764   :  { %1495 = dma.vmem_to_hbm [thread:$0]  %s1488_s0, 256, %s1490_s30, [#allocation5], %s1695_s9, %s1695_s9, %s1696_s11  }
 0x765   :  { %1671 = dma.done.wait [#allocation5], 256  }
 0x766   :  { %1672 = vsyncadd [#allocation5], 4294967040 }
 0x767   :  { %1500 = vsyncpa [#allocation4], 1 }
 0x768   :  { %1501 = vsyncpa [#allocation7], 1 }
 0x769   :  { %1502 = vsyncpa [#allocation5], 1 }

</bundles_post_ra>
